<compile_context>
chip_gen: v6e
topology: v6e:2x2x1
jax: 0.10.0
libtpu: 0.0.40
codegen_flags: <defaults>
</compile_context>

<pallas_src>
import functools
import math

import jax
import jax.numpy as jnp
from jax.experimental import pallas as pl
from jax.experimental.pallas import tpu as pltpu

LN_EPS = 1e-5


def _layer_norm(v, gamma, beta):
    mu = jnp.mean(v, axis=-1, keepdims=True)
    var = jnp.mean((v - mu) ** 2, axis=-1, keepdims=True)
    return (v - mu) * jax.lax.rsqrt(var + LN_EPS) * gamma + beta


def _set_transformer_kernel(x_ref, wqkv_ref, w3_ref, vecs_ref, out_ref, *, num_heads):
    TN, S, D = x_ref.shape
    R = TN * S
    head_dim = D // num_heads
    scale = 1.0 / math.sqrt(head_dim)

    x = x_ref[...].reshape(R, D)                    # (TN*S, D)
    vecs = vecs_ref[...]                            # (10, D)
    ln1g, ln1b = vecs[0], vecs[1]
    bq, bk, bv = vecs[2], vecs[3], vecs[4]
    bo = vecs[5]
    ln2g, ln2b = vecs[6], vecs[7]
    b1, b2 = vecs[8], vecs[9]

    # --- LayerNorm 1 ---
    y = _layer_norm(x, ln1g, ln1b)                  # (R, D)

    # --- fused QKV projection (one MXU pass) ---
    qkv = jnp.dot(y, wqkv_ref[...], preferred_element_type=jnp.float32)  # (R, 3D)
    q = qkv[:, :D] + bq
    k = qkv[:, D:2 * D] + bk
    v = qkv[:, 2 * D:] + bv

    # --- multi-head self-attention, batched over the TN sets per head ---
    ctx_heads = []
    for h in range(num_heads):                      # static unroll (tiny H)
        sl = slice(h * head_dim, (h + 1) * head_dim)
        qh = (q[:, sl] * scale).reshape(TN, S, head_dim)
        kh = k[:, sl].reshape(TN, S, head_dim)
        vh = v[:, sl].reshape(TN, S, head_dim)
        s_ = jnp.einsum("nsd,ntd->nst", qh, kh,
                        preferred_element_type=jnp.float32)   # (TN, S, S)
        s_ = s_ - jnp.max(s_, axis=-1, keepdims=True)
        e = jnp.exp(s_)
        p = e * pl.reciprocal(jnp.sum(e, axis=-1, keepdims=True), approx=True)
        ctx_h = jnp.einsum("nst,ntd->nsd", p, vh,
                           preferred_element_type=jnp.float32)
        ctx_heads.append(ctx_h.reshape(R, head_dim))
    ctx = jnp.concatenate(ctx_heads, axis=-1)       # (R, D)

    attn = jnp.dot(ctx, w3_ref[0], preferred_element_type=jnp.float32) + bo

    # residual (onto LN1 output, matching the PyTorch module) + LayerNorm 2
    z = _layer_norm(y + attn, ln2g, ln2b)

    # --- feed-forward (Linear -> ReLU -> Linear) + residual ---
    h1 = jnp.maximum(
        jnp.dot(z, w3_ref[1], preferred_element_type=jnp.float32) + b1, 0.0)
    ff = jnp.dot(h1, w3_ref[2], preferred_element_type=jnp.float32) + b2
    out = z + ff                                    # (R, D)

    # --- mean over the set dimension (folded 1/S multiply) ---
    pooled = out.reshape(TN, S, D).sum(axis=1) * (1.0 / S)    # (TN, D)
    out_ref[0] = pooled


def set_transformer_pallas(x, params, num_heads=2, sets_per_block=None):
    B, L, S, D = x.shape
    N = B * L
    if sets_per_block is None:
        # Two grid steps by default so the two v7x TensorCores both get work;
        # each block is tiny relative to VMEM at these sizes.
        sets_per_block = N // 2 if (N % 2 == 0 and N >= 2) else N
    TN = sets_per_block
    assert N % TN == 0, "sets_per_block must divide B*L"
    G = N // TN

    xr = x.reshape(N, S, D)

    # Fused / packed parameters (weights stored in (in, out) orientation).
    wqkv = jnp.concatenate([params["wq"], params["wk"], params["wv"]], axis=1)  # (D, 3D)
    w3 = jnp.stack([params["wo"], params["w1"], params["w2"]], axis=0)          # (3, D, D)
    vecs = jnp.stack([params["ln1_g"], params["ln1_b"],
                      params["bq"], params["bk"], params["bv"],
                      params["bo"], params["ln2_g"], params["ln2_b"],
                      params["b1"], params["b2"]], axis=0)                      # (10, D)

    kernel = functools.partial(_set_transformer_kernel, num_heads=num_heads)

    out = pl.pallas_call(
        kernel,
        out_shape=jax.ShapeDtypeStruct((G, TN, D), jnp.float32),
        grid=(G,),
        in_specs=[
            pl.BlockSpec((TN, S, D), lambda g: (g, 0, 0)),
            pl.BlockSpec(wqkv.shape, lambda g: (0, 0)),
            pl.BlockSpec(w3.shape, lambda g: (0, 0, 0)),
            pl.BlockSpec(vecs.shape, lambda g: (0, 0)),
        ],
        out_specs=pl.BlockSpec((1, TN, D), lambda g: (g, 0, 0)),
        compiler_params=pltpu.CompilerParams(
            dimension_semantics=("parallel",),
            vmem_limit_bytes=32 * 1024 * 1024,
        ),
    )(xr, wqkv, w3, vecs)

    return out.reshape(B, L, D)


def set_transformer_reference(x, params, num_heads=2):
    """Pure-JAX reference with identical math, for verification."""
    B, L, S, D = x.shape
    xr = x.reshape(B * L, S, D)
    head_dim = D // num_heads
    scale = 1.0 / math.sqrt(head_dim)

    y = _layer_norm(xr, params["ln1_g"], params["ln1_b"])
    q = y @ params["wq"] + params["bq"]
    k = y @ params["wk"] + params["bk"]
    v = y @ params["wv"] + params["bv"]

    def split(t):  # (N,S,D) -> (N,H,S,Dh)
        return t.reshape(t.shape[0], S, num_heads, head_dim).transpose(0, 2, 1, 3)

    qh, kh, vh = split(q) * scale, split(k), split(v)
    s = jnp.einsum("nhsd,nhtd->nhst", qh, kh)
    p = jax.nn.softmax(s, axis=-1)
    ctx = jnp.einsum("nhst,nhtd->nhsd", p, vh).transpose(0, 2, 1, 3).reshape(-1, S, D)
    attn = ctx @ params["wo"] + params["bo"]
    z = _layer_norm(y + attn, params["ln2_g"], params["ln2_b"])
    h1 = jnp.maximum(z @ params["w1"] + params["b1"], 0.0)
    ff = h1 @ params["w2"] + params["b2"]
    out = (z + ff).mean(axis=-2)
    return out.reshape(B, L, D)


def init_params(key, D):
    ks = jax.random.split(key, 8)
    n = lambda k, shape: (0.1 * jax.random.normal(k, shape)).astype(jnp.float32)
    return {
        "ln1_g": jnp.ones((D,), jnp.float32),
        "ln1_b": jnp.zeros((D,), jnp.float32),
        # attention projections stored in (in, out) orientation for the kernel
        "wq": n(ks[0], (D, D)), "wk": n(ks[1], (D, D)), "wv": n(ks[2], (D, D)),
        "bq": jnp.zeros((D,), jnp.float32),
        "bk": jnp.zeros((D,), jnp.float32),
        "bv": jnp.zeros((D,), jnp.float32),
        "wo": n(ks[3], (D, D)),
        "bo": n(ks[4], (D,)),
        "ln2_g": jnp.ones((D,), jnp.float32),
        "ln2_b": jnp.zeros((D,), jnp.float32),
        "w1": n(ks[5], (D, D)), "b1": n(ks[6], (D,)),
        "w2": n(ks[7], (D, D)), "b2": jnp.zeros((D,), jnp.float32),
    }


if __name__ == "__main__":
    B, L, S, D = 2, 4, 8, 32
    num_heads = 2

    key = jax.random.PRNGKey(0)
    kx, kp = jax.random.split(key)
    x = jax.random.normal(kx, (B, L, S, D), dtype=jnp.float32)
    params = init_params(kp, D)

    out = set_transformer_pallas(x, params, num_heads=num_heads)
    out = jax.block_until_ready(out)

    ref = set_transformer_reference(x, params, num_heads=num_heads)
    assert out.shape == (B, L, D)
    # Slightly looser tolerance than pure-f32: softmax denom uses the EUP
    # approximate reciprocal (pl.reciprocal(..., approx=True)).
    assert jnp.allclose(out, ref, atol=5e-3, rtol=5e-3), "mismatch vs reference"

    print("KERNEL_OK")
</pallas_src>

<mosaic_0001>
module attributes {stable_mosaic.version = 11 : i64} {
  func.func @_set_transformer_kernel(%arg0: i32, %arg1: memref<4x8x32xf32, #tpu.memory_space<vmem>>, %arg2: memref<32x96xf32, #tpu.memory_space<vmem>>, %arg3: memref<3x32x32xf32, #tpu.memory_space<vmem>>, %arg4: memref<10x32xf32, #tpu.memory_space<vmem>>, %arg5: memref<1x4x32xf32, #tpu.memory_space<vmem>>) attributes {dimension_semantics = [#tpu.dimension_semantics<parallel>], iteration_bounds = array<i64: 2>, scalar_prefetch = 0 : i64, scratch_operands = 0 : i64, tpu.core_type = #tpu.core_type<tc>, window_params = [{transform_indices = @transform_0, window_bounds = array<i64: 4, 8, 32>}, {pipeline_mode = #tpu.pipeline_mode<synchronous>, transform_indices = @transform_1, window_bounds = array<i64: 32, 96>}, {pipeline_mode = #tpu.pipeline_mode<synchronous>, transform_indices = @transform_2, window_bounds = array<i64: 3, 32, 32>}, {pipeline_mode = #tpu.pipeline_mode<synchronous>, transform_indices = @transform_3, window_bounds = array<i64: 10, 32>}, {transform_indices = @transform_4, window_bounds = array<i64: 1, 4, 32>}]} {
    %c0 = arith.constant 0 : index
    %c0_0 = arith.constant 0 : index
    %c0_1 = arith.constant 0 : index
    %0 = vector.load %arg1[%c0, %c0_0, %c0_1] : memref<4x8x32xf32, #tpu.memory_space<vmem>>, vector<4x8x32xf32>
    %1 = vector.shape_cast %0 : vector<4x8x32xf32> to vector<32x32xf32>
    %c0_2 = arith.constant 0 : index
    %c0_3 = arith.constant 0 : index
    %2 = vector.load %arg4[%c0_2, %c0_3] : memref<10x32xf32, #tpu.memory_space<vmem>>, vector<10x32xf32>
    %3 = vector.extract_strided_slice %2 {offsets = [0, 0], sizes = [1, 32], strides = [1, 1]} : vector<10x32xf32> to vector<1x32xf32>
    %4 = vector.shape_cast %3 : vector<1x32xf32> to vector<32xf32>
    %5 = vector.extract_strided_slice %2 {offsets = [1, 0], sizes = [1, 32], strides = [1, 1]} : vector<10x32xf32> to vector<1x32xf32>
    %6 = vector.shape_cast %5 : vector<1x32xf32> to vector<32xf32>
    %7 = vector.extract_strided_slice %2 {offsets = [2, 0], sizes = [1, 32], strides = [1, 1]} : vector<10x32xf32> to vector<1x32xf32>
    %8 = vector.shape_cast %7 : vector<1x32xf32> to vector<32xf32>
    %9 = vector.extract_strided_slice %2 {offsets = [3, 0], sizes = [1, 32], strides = [1, 1]} : vector<10x32xf32> to vector<1x32xf32>
    %10 = vector.shape_cast %9 : vector<1x32xf32> to vector<32xf32>
    %11 = vector.extract_strided_slice %2 {offsets = [4, 0], sizes = [1, 32], strides = [1, 1]} : vector<10x32xf32> to vector<1x32xf32>
    %12 = vector.shape_cast %11 : vector<1x32xf32> to vector<32xf32>
    %13 = vector.extract_strided_slice %2 {offsets = [5, 0], sizes = [1, 32], strides = [1, 1]} : vector<10x32xf32> to vector<1x32xf32>
    %14 = vector.shape_cast %13 : vector<1x32xf32> to vector<32xf32>
    %15 = vector.extract_strided_slice %2 {offsets = [6, 0], sizes = [1, 32], strides = [1, 1]} : vector<10x32xf32> to vector<1x32xf32>
    %16 = vector.shape_cast %15 : vector<1x32xf32> to vector<32xf32>
    %17 = vector.extract_strided_slice %2 {offsets = [7, 0], sizes = [1, 32], strides = [1, 1]} : vector<10x32xf32> to vector<1x32xf32>
    %18 = vector.shape_cast %17 : vector<1x32xf32> to vector<32xf32>
    %19 = vector.extract_strided_slice %2 {offsets = [8, 0], sizes = [1, 32], strides = [1, 1]} : vector<10x32xf32> to vector<1x32xf32>
    %20 = vector.shape_cast %19 : vector<1x32xf32> to vector<32xf32>
    %21 = vector.extract_strided_slice %2 {offsets = [9, 0], sizes = [1, 32], strides = [1, 1]} : vector<10x32xf32> to vector<1x32xf32>
    %22 = vector.shape_cast %21 : vector<1x32xf32> to vector<32xf32>
    %cst = arith.constant dense<0.000000e+00> : vector<32xf32>
    %23 = vector.multi_reduction <add>, %1, %cst [1] : vector<32x32xf32> to vector<32xf32>
    %24 = vector.shape_cast %23 : vector<32xf32> to vector<32x1xf32>
    %cst_4 = arith.constant 3.200000e+01 : f32
    %25 = vector.broadcast %cst_4 : f32 to vector<32x1xf32>
    %26 = arith.divf %24, %25 : vector<32x1xf32>
    %27 = vector.broadcast %26 : vector<32x1xf32> to vector<32x32xf32>
    %28 = arith.subf %1, %27 : vector<32x32xf32>
    %29 = arith.mulf %28, %28 : vector<32x32xf32>
    %cst_5 = arith.constant dense<0.000000e+00> : vector<32xf32>
    %30 = vector.multi_reduction <add>, %29, %cst_5 [1] : vector<32x32xf32> to vector<32xf32>
    %31 = vector.shape_cast %30 : vector<32xf32> to vector<32x1xf32>
    %cst_6 = arith.constant 3.200000e+01 : f32
    %32 = vector.broadcast %cst_6 : f32 to vector<32x1xf32>
    %33 = arith.divf %31, %32 : vector<32x1xf32>
    %34 = vector.broadcast %26 : vector<32x1xf32> to vector<32x32xf32>
    %35 = arith.subf %1, %34 : vector<32x32xf32>
    %cst_7 = arith.constant 9.99999974E-6 : f32
    %36 = vector.broadcast %cst_7 : f32 to vector<32x1xf32>
    %37 = arith.addf %33, %36 : vector<32x1xf32>
    %38 = math.rsqrt %37 : vector<32x1xf32>
    %39 = vector.broadcast %38 : vector<32x1xf32> to vector<32x32xf32>
    %40 = arith.mulf %35, %39 : vector<32x32xf32>
    %41 = vector.shape_cast %4 : vector<32xf32> to vector<1x32xf32>
    %42 = vector.broadcast %41 : vector<1x32xf32> to vector<32x32xf32>
    %43 = arith.mulf %40, %42 : vector<32x32xf32>
    %44 = vector.shape_cast %6 : vector<32xf32> to vector<1x32xf32>
    %45 = vector.broadcast %44 : vector<1x32xf32> to vector<32x32xf32>
    %46 = arith.addf %43, %45 : vector<32x32xf32>
    %c0_8 = arith.constant 0 : index
    %c0_9 = arith.constant 0 : index
    %47 = vector.load %arg2[%c0_8, %c0_9] : memref<32x96xf32, #tpu.memory_space<vmem>>, vector<32x96xf32>
    %cst_10 = arith.constant dense<0.000000e+00> : vector<32x96xf32>
    %48 = tpu.matmul %46, %47, %cst_10 {dimension_numbers = #tpu.dot_dimension_numbers<[1], [0], [0], [1], [0, 0, 1, 1], [], []>} : vector<32x32xf32>, vector<32x96xf32>, vector<32x96xf32> -> vector<32x96xf32>
    %49 = vector.extract_strided_slice %48 {offsets = [0, 0], sizes = [32, 32], strides = [1, 1]} : vector<32x96xf32> to vector<32x32xf32>
    %50 = vector.shape_cast %8 : vector<32xf32> to vector<1x32xf32>
    %51 = vector.broadcast %50 : vector<1x32xf32> to vector<32x32xf32>
    %52 = arith.addf %49, %51 : vector<32x32xf32>
    %53 = vector.extract_strided_slice %48 {offsets = [0, 32], sizes = [32, 32], strides = [1, 1]} : vector<32x96xf32> to vector<32x32xf32>
    %54 = vector.shape_cast %10 : vector<32xf32> to vector<1x32xf32>
    %55 = vector.broadcast %54 : vector<1x32xf32> to vector<32x32xf32>
    %56 = arith.addf %53, %55 : vector<32x32xf32>
    %57 = vector.extract_strided_slice %48 {offsets = [0, 64], sizes = [32, 32], strides = [1, 1]} : vector<32x96xf32> to vector<32x32xf32>
    %58 = vector.shape_cast %12 : vector<32xf32> to vector<1x32xf32>
    %59 = vector.broadcast %58 : vector<1x32xf32> to vector<32x32xf32>
    %60 = arith.addf %57, %59 : vector<32x32xf32>
    %61 = vector.extract_strided_slice %52 {offsets = [0, 0], sizes = [32, 16], strides = [1, 1]} : vector<32x32xf32> to vector<32x16xf32>
    %cst_11 = arith.constant 2.500000e-01 : f32
    %62 = vector.broadcast %cst_11 : f32 to vector<32x16xf32>
    %63 = arith.mulf %61, %62 : vector<32x16xf32>
    %64 = vector.shape_cast %63 : vector<32x16xf32> to vector<4x8x16xf32>
    %65 = vector.extract_strided_slice %56 {offsets = [0, 0], sizes = [32, 16], strides = [1, 1]} : vector<32x32xf32> to vector<32x16xf32>
    %66 = vector.shape_cast %65 : vector<32x16xf32> to vector<4x8x16xf32>
    %67 = vector.extract_strided_slice %60 {offsets = [0, 0], sizes = [32, 16], strides = [1, 1]} : vector<32x32xf32> to vector<32x16xf32>
    %68 = vector.shape_cast %67 : vector<32x16xf32> to vector<4x8x16xf32>
    "tpu.trace_start"() <{level = 10 : i32, message = "nsd,ntd->nst"}> : () -> ()
    %cst_12 = arith.constant dense<0.000000e+00> : vector<4x8x8xf32>
    %69 = tpu.matmul %64, %66, %cst_12 {dimension_numbers = #tpu.dot_dimension_numbers<[2], [2], [1], [1], [0, 0, 0, 1, 1, 1], [0], [0]>} : vector<4x8x16xf32>, vector<4x8x16xf32>, vector<4x8x8xf32> -> vector<4x8x8xf32>
    "tpu.trace_stop"() : () -> ()
    %cst_13 = arith.constant dense<0xFF800000> : vector<4x8xf32>
    %70 = vector.multi_reduction <maximumf>, %69, %cst_13 [2] : vector<4x8x8xf32> to vector<4x8xf32>
    %71 = vector.shape_cast %70 : vector<4x8xf32> to vector<4x8x1xf32>
    %72 = vector.broadcast %71 : vector<4x8x1xf32> to vector<4x8x8xf32>
    %73 = arith.subf %69, %72 : vector<4x8x8xf32>
    %74 = math.exp %73 : vector<4x8x8xf32>
    %cst_14 = arith.constant dense<0.000000e+00> : vector<4x8xf32>
    %75 = vector.multi_reduction <add>, %74, %cst_14 [2] : vector<4x8x8xf32> to vector<4x8xf32>
    %76 = vector.shape_cast %75 : vector<4x8xf32> to vector<4x8x1xf32>
    %77 = tpu.reciprocal %76 {approx = true} : vector<4x8x1xf32> -> vector<4x8x1xf32>
    %78 = vector.broadcast %77 : vector<4x8x1xf32> to vector<4x8x8xf32>
    %79 = arith.mulf %74, %78 : vector<4x8x8xf32>
    "tpu.trace_start"() <{level = 10 : i32, message = "nst,ntd->nsd"}> : () -> ()
    %cst_15 = arith.constant dense<0.000000e+00> : vector<4x8x16xf32>
    %80 = tpu.matmul %79, %68, %cst_15 {dimension_numbers = #tpu.dot_dimension_numbers<[2], [1], [1], [2], [0, 0, 0, 1, 1, 2], [0], [0]>} : vector<4x8x8xf32>, vector<4x8x16xf32>, vector<4x8x16xf32> -> vector<4x8x16xf32>
    "tpu.trace_stop"() : () -> ()
    %81 = vector.shape_cast %80 : vector<4x8x16xf32> to vector<32x16xf32>
    %82 = vector.extract_strided_slice %52 {offsets = [0, 16], sizes = [32, 16], strides = [1, 1]} : vector<32x32xf32> to vector<32x16xf32>
    %cst_16 = arith.constant 2.500000e-01 : f32
    %83 = vector.broadcast %cst_16 : f32 to vector<32x16xf32>
    %84 = arith.mulf %82, %83 : vector<32x16xf32>
    %85 = vector.shape_cast %84 : vector<32x16xf32> to vector<4x8x16xf32>
    %86 = vector.extract_strided_slice %56 {offsets = [0, 16], sizes = [32, 16], strides = [1, 1]} : vector<32x32xf32> to vector<32x16xf32>
    %87 = vector.shape_cast %86 : vector<32x16xf32> to vector<4x8x16xf32>
    %88 = vector.extract_strided_slice %60 {offsets = [0, 16], sizes = [32, 16], strides = [1, 1]} : vector<32x32xf32> to vector<32x16xf32>
    %89 = vector.shape_cast %88 : vector<32x16xf32> to vector<4x8x16xf32>
    "tpu.trace_start"() <{level = 10 : i32, message = "nsd,ntd->nst"}> : () -> ()
    %cst_17 = arith.constant dense<0.000000e+00> : vector<4x8x8xf32>
    %90 = tpu.matmul %85, %87, %cst_17 {dimension_numbers = #tpu.dot_dimension_numbers<[2], [2], [1], [1], [0, 0, 0, 1, 1, 1], [0], [0]>} : vector<4x8x16xf32>, vector<4x8x16xf32>, vector<4x8x8xf32> -> vector<4x8x8xf32>
    "tpu.trace_stop"() : () -> ()
    %cst_18 = arith.constant dense<0xFF800000> : vector<4x8xf32>
    %91 = vector.multi_reduction <maximumf>, %90, %cst_18 [2] : vector<4x8x8xf32> to vector<4x8xf32>
    %92 = vector.shape_cast %91 : vector<4x8xf32> to vector<4x8x1xf32>
    %93 = vector.broadcast %92 : vector<4x8x1xf32> to vector<4x8x8xf32>
    %94 = arith.subf %90, %93 : vector<4x8x8xf32>
    %95 = math.exp %94 : vector<4x8x8xf32>
    %cst_19 = arith.constant dense<0.000000e+00> : vector<4x8xf32>
    %96 = vector.multi_reduction <add>, %95, %cst_19 [2] : vector<4x8x8xf32> to vector<4x8xf32>
    %97 = vector.shape_cast %96 : vector<4x8xf32> to vector<4x8x1xf32>
    %98 = tpu.reciprocal %97 {approx = true} : vector<4x8x1xf32> -> vector<4x8x1xf32>
    %99 = vector.broadcast %98 : vector<4x8x1xf32> to vector<4x8x8xf32>
    %100 = arith.mulf %95, %99 : vector<4x8x8xf32>
    "tpu.trace_start"() <{level = 10 : i32, message = "nst,ntd->nsd"}> : () -> ()
    %cst_20 = arith.constant dense<0.000000e+00> : vector<4x8x16xf32>
    %101 = tpu.matmul %100, %89, %cst_20 {dimension_numbers = #tpu.dot_dimension_numbers<[2], [1], [1], [2], [0, 0, 0, 1, 1, 2], [0], [0]>} : vector<4x8x8xf32>, vector<4x8x16xf32>, vector<4x8x16xf32> -> vector<4x8x16xf32>
    "tpu.trace_stop"() : () -> ()
    %102 = vector.shape_cast %101 : vector<4x8x16xf32> to vector<32x16xf32>
    %103 = tpu.concatenate %81, %102 in 1 : vector<32x16xf32>, vector<32x16xf32> -> vector<32x32xf32>
    %c0_21 = arith.constant 0 : index
    %c0_22 = arith.constant 0 : index
    %c0_23 = arith.constant 0 : index
    %104 = vector.load %arg3[%c0_21, %c0_22, %c0_23] : memref<3x32x32xf32, #tpu.memory_space<vmem>>, vector<1x32x32xf32>
    %105 = vector.shape_cast %104 : vector<1x32x32xf32> to vector<32x32xf32>
    %cst_24 = arith.constant dense<0.000000e+00> : vector<32x32xf32>
    %106 = tpu.matmul %103, %105, %cst_24 {dimension_numbers = #tpu.dot_dimension_numbers<[1], [0], [0], [1], [0, 0, 1, 1], [], []>} : vector<32x32xf32>, vector<32x32xf32>, vector<32x32xf32> -> vector<32x32xf32>
    %107 = vector.shape_cast %14 : vector<32xf32> to vector<1x32xf32>
    %108 = vector.broadcast %107 : vector<1x32xf32> to vector<32x32xf32>
    %109 = arith.addf %106, %108 : vector<32x32xf32>
    %110 = arith.addf %46, %109 : vector<32x32xf32>
    %cst_25 = arith.constant dense<0.000000e+00> : vector<32xf32>
    %111 = vector.multi_reduction <add>, %110, %cst_25 [1] : vector<32x32xf32> to vector<32xf32>
    %112 = vector.shape_cast %111 : vector<32xf32> to vector<32x1xf32>
    %cst_26 = arith.constant 3.200000e+01 : f32
    %113 = vector.broadcast %cst_26 : f32 to vector<32x1xf32>
    %114 = arith.divf %112, %113 : vector<32x1xf32>
    %115 = vector.broadcast %114 : vector<32x1xf32> to vector<32x32xf32>
    %116 = arith.subf %110, %115 : vector<32x32xf32>
    %117 = arith.mulf %116, %116 : vector<32x32xf32>
    %cst_27 = arith.constant dense<0.000000e+00> : vector<32xf32>
    %118 = vector.multi_reduction <add>, %117, %cst_27 [1] : vector<32x32xf32> to vector<32xf32>
    %119 = vector.shape_cast %118 : vector<32xf32> to vector<32x1xf32>
    %cst_28 = arith.constant 3.200000e+01 : f32
    %120 = vector.broadcast %cst_28 : f32 to vector<32x1xf32>
    %121 = arith.divf %119, %120 : vector<32x1xf32>
    %122 = vector.broadcast %114 : vector<32x1xf32> to vector<32x32xf32>
    %123 = arith.subf %110, %122 : vector<32x32xf32>
    %cst_29 = arith.constant 9.99999974E-6 : f32
    %124 = vector.broadcast %cst_29 : f32 to vector<32x1xf32>
    %125 = arith.addf %121, %124 : vector<32x1xf32>
    %126 = math.rsqrt %125 : vector<32x1xf32>
    %127 = vector.broadcast %126 : vector<32x1xf32> to vector<32x32xf32>
    %128 = arith.mulf %123, %127 : vector<32x32xf32>
    %129 = vector.shape_cast %16 : vector<32xf32> to vector<1x32xf32>
    %130 = vector.broadcast %129 : vector<1x32xf32> to vector<32x32xf32>
    %131 = arith.mulf %128, %130 : vector<32x32xf32>
    %132 = vector.shape_cast %18 : vector<32xf32> to vector<1x32xf32>
    %133 = vector.broadcast %132 : vector<1x32xf32> to vector<32x32xf32>
    %134 = arith.addf %131, %133 : vector<32x32xf32>
    %c1 = arith.constant 1 : index
    %c0_30 = arith.constant 0 : index
    %c0_31 = arith.constant 0 : index
    %135 = vector.load %arg3[%c1, %c0_30, %c0_31] : memref<3x32x32xf32, #tpu.memory_space<vmem>>, vector<1x32x32xf32>
    %136 = vector.shape_cast %135 : vector<1x32x32xf32> to vector<32x32xf32>
    %cst_32 = arith.constant dense<0.000000e+00> : vector<32x32xf32>
    %137 = tpu.matmul %134, %136, %cst_32 {dimension_numbers = #tpu.dot_dimension_numbers<[1], [0], [0], [1], [0, 0, 1, 1], [], []>} : vector<32x32xf32>, vector<32x32xf32>, vector<32x32xf32> -> vector<32x32xf32>
    %138 = vector.shape_cast %20 : vector<32xf32> to vector<1x32xf32>
    %139 = vector.broadcast %138 : vector<1x32xf32> to vector<32x32xf32>
    %140 = arith.addf %137, %139 : vector<32x32xf32>
    %cst_33 = arith.constant 0.000000e+00 : f32
    %141 = vector.broadcast %cst_33 : f32 to vector<32x32xf32>
    %142 = arith.maximumf %140, %141 : vector<32x32xf32>
    %c2 = arith.constant 2 : index
    %c0_34 = arith.constant 0 : index
    %c0_35 = arith.constant 0 : index
    %143 = vector.load %arg3[%c2, %c0_34, %c0_35] : memref<3x32x32xf32, #tpu.memory_space<vmem>>, vector<1x32x32xf32>
    %144 = vector.shape_cast %143 : vector<1x32x32xf32> to vector<32x32xf32>
    %cst_36 = arith.constant dense<0.000000e+00> : vector<32x32xf32>
    %145 = tpu.matmul %142, %144, %cst_36 {dimension_numbers = #tpu.dot_dimension_numbers<[1], [0], [0], [1], [0, 0, 1, 1], [], []>} : vector<32x32xf32>, vector<32x32xf32>, vector<32x32xf32> -> vector<32x32xf32>
    %146 = vector.shape_cast %22 : vector<32xf32> to vector<1x32xf32>
    %147 = vector.broadcast %146 : vector<1x32xf32> to vector<32x32xf32>
    %148 = arith.addf %145, %147 : vector<32x32xf32>
    %149 = arith.addf %134, %148 : vector<32x32xf32>
    %150 = vector.shape_cast %149 : vector<32x32xf32> to vector<4x8x32xf32>
    %cst_37 = arith.constant dense<0.000000e+00> : vector<4x32xf32>
    %151 = vector.multi_reduction <add>, %150, %cst_37 [1] : vector<4x8x32xf32> to vector<4x32xf32>
    %cst_38 = arith.constant 1.250000e-01 : f32
    %152 = vector.broadcast %cst_38 : f32 to vector<4x32xf32>
    %153 = arith.mulf %151, %152 : vector<4x32xf32>
    %c0_39 = arith.constant 0 : index
    %c0_40 = arith.constant 0 : index
    %c0_41 = arith.constant 0 : index
    %154 = vector.load %arg5[%c0_39, %c0_40, %c0_41] : memref<1x4x32xf32, #tpu.memory_space<vmem>>, vector<1x4x32xf32>
    %155 = vector.shape_cast %154 : vector<1x4x32xf32> to vector<4x32xf32>
    %156 = vector.shape_cast %153 : vector<4x32xf32> to vector<1x4x32xf32>
    tpu.vector_store %arg5[%c0_39, %c0_40, %c0_41], %156 {strides = array<i32>} : memref<1x4x32xf32, #tpu.memory_space<vmem>>, vector<1x4x32xf32>,
    return
  }
  func.func @transform_0(%arg0: i32) -> (i32, i32, i32) {
    %c0_i32 = arith.constant 0 : i32
    %c0_i32_0 = arith.constant 0 : i32
    %c0_i32_1 = arith.constant 0 : i32
    return %arg0, %c0_i32, %c0_i32_0 : i32, i32, i32
  }
  func.func @transform_1(%arg0: i32) -> (i32, i32) {
    %c0_i32 = arith.constant 0 : i32
    %c0_i32_0 = arith.constant 0 : i32
    %c0_i32_1 = arith.constant 0 : i32
    return %c0_i32, %c0_i32_0 : i32, i32
  }
  func.func @transform_2(%arg0: i32) -> (i32, i32, i32) {
    %c0_i32 = arith.constant 0 : i32
    %c0_i32_0 = arith.constant 0 : i32
    %c0_i32_1 = arith.constant 0 : i32
    %c0_i32_2 = arith.constant 0 : i32
    return %c0_i32, %c0_i32_0, %c0_i32_1 : i32, i32, i32
  }
  func.func @transform_3(%arg0: i32) -> (i32, i32) {
    %c0_i32 = arith.constant 0 : i32
    %c0_i32_0 = arith.constant 0 : i32
    %c0_i32_1 = arith.constant 0 : i32
    return %c0_i32, %c0_i32_0 : i32, i32
  }
  func.func @transform_4(%arg0: i32) -> (i32, i32, i32) {
    %c0_i32 = arith.constant 0 : i32
    %c0_i32_0 = arith.constant 0 : i32
    %c0_i32_1 = arith.constant 0 : i32
    return %arg0, %c0_i32, %c0_i32_0 : i32, i32, i32
  }
}

</mosaic_0001>

<bundles_post_ra>
// kernel: tpu_custom_call.1
= control target key start
LH: loop header
LB: loop body
LE: loop exit
PB: predicated region body
PF: predicated region fallthrough
CT: control target
= control target key end

     0   :  { %9 = vsyncpa [#allocation3], 0  ;;  %s3464_s0 = inlined_call_operand.hbm [shape: f32[8,8,32], index: 0, kind: input, shape index: {}]   ;;  %s3465_s1 = inlined_call_operand.hbm [shape: f32[32,96], index: 1, kind: input, shape index: {}]   ;;  %s3466_s2 = inlined_call_operand.hbm [shape: f32[3,32,32], index: 2, kind: input, shape index: {}]   ;;  %s3467_s3 = inlined_call_operand.hbm [shape: f32[10,32], index: 3, kind: input, shape index: {}]   ;;  %s3468_s4 = inlined_call_operand.hbm [shape: f32[2,4,32], index: 4, kind: output, shape index: {}]  }
   0x1   :  { %11 = vsyncpa [#allocation3 + $0x1], 0 }
   0x2   :  { %12 = vsyncpa [#allocation6], 0 }
   0x3   :  { %13 = vsyncpa [#allocation9], 0 }
   0x4   :  { %14 = vsyncpa [#allocation4], 0 }
   0x5   :  { %16 = vsyncpa [#allocation4 + $0x1], 0  ;;  %s2992_s15 = smov 0   ;;  %s2994_s16 = smov 0  }
   0x6   :  { %s2996_s17 = smov 0   ;;  %s2998_s18 = smov 0  }
   0x7 LB: > { %s3013_s19 = sadd.s32 4294967295, %s2949_s18   ;;  %s2375_s20 = sadd.s32 4294967294, %s2949_s18   ;;  %s2949_s18 = sphi %s2998_s18, %s3491_s18   ;;  %s2945_s17 = sphi %s2996_s17, %s3490_s17   ;;  %s2941_s16 = sphi %s2994_s16, %s3489_s16   ;;  %s2937_s15 = sphi %s2992_s15, %s3488_s15  }
   0x8   : > { %p42_p0 = scmp.ne.s32.totalorder %s2941_s16, %s2937_s15  ;;  %p3469_p1 = scmp.eq.s32.totalorder %s3013_s19, 0 }
   0x9   : > { %p129_p2 = scmp.eq.s32.totalorder %s3013_s19, 1  ;;  %p135_p3 = scmp.eq.s32.totalorder %s2375_s20, 1 }
   0xa   : > { %p3022_p4 = por %p3469_p1, %p42_p0  ;;  %p2376_p5 = scmp.ge.s32.totalorder %s2949_s18, 1 }
   0xb   : > { %p3027_p6 = por %p135_p3, %p42_p0  ;;  %p142_p7 = scmp.lt.s32.totalorder %s2949_s18, 3 }
   0xc   : > { %s3473_s21 = scalar_select %p3022_p4, 1, 0 }
   0xd   : > { %s3474_s22 = scalar_select %p3027_p6, 1, 0 }
   0xe   : > { %p3032_p8 = pnand %p2376_p5, %p142_p7  ;;  %s2951_s24 = smov [#allocation5]  }
   0xf   : > { %s154_s25 = sshll.u32 %s2951_s24, 4  ;;  %s2952_s27 = smov [#allocation7]   ;;  %s155_s25 = int_to_ptr.vmem [resolvable:$true] %s154_s25 }
  0x10   : > { %s3475_s23 = scalar_select %p3032_p8, 1, 0 }
  0x11   : > { %p2651_p9 = pneg %p3032_p8  ;;  %s167_s28 = sshll.u32 %s2952_s27, 4  ;;  %s168_s28 = int_to_ptr.vmem [resolvable:$true] %s167_s28 }
  0x12   : > { %s2953_s29 = smov [#allocation8]   ;;  %s2782_s5 = scalar_lea.vmem %s155_s25, 512 }
  0x13   : > { %p3041_p11 = pnand %p2651_p9, %p3469_p1  ;;  %s180_s30 = sshll.u32 %s2953_s29, 4  ;;  %s181_s30 = int_to_ptr.vmem [resolvable:$true] %s180_s30 }
  0x14   : > { %p2783_p13 = scmp.ne.s32.totalorder %s155_s25, %s2782_s5  ;;  %p2790_p5 = scmp.lt.s32.totalorder %s155_s25, %s155_s25 }
  0x15   : > { %p2773_p12 = pneg %p3041_p11  ;;  %p2791_p7 = scmp.lt.s32.totalorder %s2782_s5, %s2782_s5 }
  0x17   : > { %p2785_p0 = pnand %p2783_p13, %p2773_p12  ;;  %p2792_p9 = por %p2791_p7, %p2790_p5 }
  0x19   : > { %p2786_p3 = pneg %p2785_p0 }
  0x1b   : > { %p2793_p10 = pnand %p2792_p9, %p2786_p3 }
  0x1d   : > { %2796 = shalt.err (!%p2793_p10)
}
  0x1e   : > { %s2954_s6 = smov 128   ;;  %s2955_s7 = smov 8  }
  0x1f   : > { %2654 = dma.hbm_to_vmem [thread:$0]  (!%p3041_p11), %s3465_s1, 512, %s155_s25, [#allocation6], %s2954_s6, %s2954_s6, %s2955_s7  }
  0x20   : > { %s2808_s10 = scalar_lea.vmem %s168_s28, 1536  ;;  %p2816_p3 = scmp.lt.s32.totalorder %s168_s28, %s168_s28 }
  0x21   : > { %p2809_p13 = scmp.ne.s32.totalorder %s168_s28, %s2808_s10  ;;  %p2817_p10 = scmp.lt.s32.totalorder %s2808_s10, %s2808_s10 }
  0x23   : > { %p2811_p0 = pnand %p2809_p13, %p2773_p12  ;;  %p2818_p7 = por %p2817_p10, %p2816_p3 }
  0x25   : > { %p2812_p5 = pneg %p2811_p0 }
  0x27   : > { %p2819_p9 = pnand %p2818_p7, %p2812_p5 }
  0x29   : > { %2822 = shalt.err (!%p2819_p9)
}
  0x2a   : > { %2657 = dma.hbm_to_vmem [thread:$0]  (!%p3041_p11), %s3466_s2, 1536, %s168_s28, [#allocation6], %s2954_s6, %s2954_s6, %s2955_s7  }
  0x2b   : > { %s2834_s13 = scalar_lea.vmem %s181_s30, 256  ;;  %p2842_p3 = scmp.lt.s32.totalorder %s181_s30, %s181_s30 }
  0x2c   : > { %p2835_p1 = scmp.ne.s32.totalorder %s181_s30, %s2834_s13  ;;  %p2843_p5 = scmp.lt.s32.totalorder %s2834_s13, %s2834_s13 }
  0x2e   : > { %p2837_p13 = pnand %p2835_p1, %p2773_p12  ;;  %p2844_p10 = por %p2843_p5, %p2842_p3 }
  0x30   : > { %p2838_p0 = pneg %p2837_p13 }
  0x32   : > { %p2845_p7 = pnand %p2844_p10, %p2838_p0 }
  0x34   : > { %2848 = shalt.err (!%p2845_p7)
}
  0x35   : > { %2660 = dma.hbm_to_vmem [thread:$0]  (!%p3041_p11), %s3467_s3, 256, %s181_s30, [#allocation9], %s2954_s6, %s2954_s6, %s2955_s7  }
  0x36   : > { %s3081_s24 = sadd.s32 1, %s2949_s18   ;;  %s29_s26 = sadd.s32 1, %s2945_s17 }
  0x37   : > { %s26_s25 = ssub.s32 %s2949_s18, %s3081_s24  ;;  %p36_p12 = scmp.ne.s32.totalorder %s2945_s17, %s2941_s16 }
  0x38   : > { %p27_p1 = scmp.eq.s32.totalorder %s26_s25, 0  ;;  %p37_p9 = scmp.eq.s32.totalorder %s2949_s18, 0 }
  0x39   : > { %p2672_p13 = scmp.lt.s32.totalorder %s2949_s18, 2  ;;  %p3095_p3 = por %p129_p2, %p36_p12 }
  0x3a   : > { %s3091_s27 = scalar_select %p27_p1, %s2945_s17, %s29_s26  }
  0x3b   : > { %p38_p0 = por %p37_p9, %p36_p12  ;;  %s194_s29 = sand.u32 1, %s2945_s17  }
  0x3c   : > { %s3477_s28 = scalar_select %p3095_p3, 1, 0 }
  0x3d   : > { %s2434_s5 = sshll.u32 %s2949_s18, 9  ;;  %s2381_s30 = sshll.u32 %s194_s29, 5 }
  0x3e   : > { %s3104_s10 = scalar_lea.hbm %s3464_s0, %s2434_s5  ;;  %s198_s11 = scalar_lea.vmem [#allocation2], %s2381_s30 }
  0x3f   : > { %s205_s12 = sshll.u32 %s198_s11, 4  ;;  %p3106_p11 = pnand %p2672_p13, %p38_p0  ;;  %s3110_s12 = int_to_ptr.vmem [resolvable:$true] %s205_s12 }
  0x40   : > { %s3112_s14 = scalar_lea.sflag [#allocation3], %s194_s29  ;;  %s2849_s20 = scalar_lea.hbm %s3104_s10, 512 }
  0x41   : > { %p2850_p2 = scmp.ne.s32.totalorder %s3104_s10, %s2849_s20  ;;  %p2851_p5 = pneg %p3106_p11 }
  0x42   : > { %s2854_s5 = scalar_lea.hbm %s3464_s0, 1024  ;;  %p2855_p1 = scmp.lt.s32.totalorder %s3104_s10, %s3464_s0 }
  0x43   : > { %p2852_p10 = pnand %p2851_p5, %p2850_p2  ;;  %p2856_p12 = scmp.lt.s32.totalorder %s2854_s5, %s2849_s20 }
  0x45   : > { %p2853_p7 = pneg %p2852_p10  ;;  %p2857_p9 = por %p2856_p12, %p2855_p1 }
  0x47   : > { %p2858_p13 = pnand %p2857_p9, %p2853_p7 }
  0x49   : > { %2861 = shalt.err (!%p2858_p13)
}
  0x4a   : > { %s2862_s29 = scalar_lea.vmem %s3110_s12, 512  ;;  %s2956_s9 = smov [#allocation2]  }
  0x4b   : > { %p2863_p0 = scmp.ne.s32.totalorder %s3110_s12, %s2862_s29  ;;  %s2867_s11 = sshll.u32 %s2956_s9, 4  ;;  %s2868_s11 = int_to_ptr.vmem [resolvable:$false] %s2867_s11 }
  0x4c   : > { %s2869_s25 = scalar_lea.vmem %s2868_s11, 1024  ;;  %p2870_p10 = scmp.lt.s32.totalorder %s3110_s12, %s2868_s11 }
  0x4d   : > { %p2865_p6 = pnand %p2863_p0, %p2851_p5  ;;  %p2871_p3 = scmp.lt.s32.totalorder %s2869_s25, %s2862_s29 }
  0x4f   : > { %p2866_p2 = pneg %p2865_p6  ;;  %p2872_p4 = por %p2871_p3, %p2870_p10 }
  0x51   : > { %p2873_p8 = pnand %p2872_p4, %p2866_p2 }
  0x53   : > { %2876 = shalt.err (!%p2873_p8)
}
  0x54   : > { %2664 = dma.hbm_to_vmem [thread:$0]  (!%p3106_p11), %s3104_s10, 512, %s3110_s12, %s3112_s14, %s2954_s6, %s2954_s6, %s2955_s7  }
  0x55   : > { %p3479_p6 = scmp.ne.s32.totalorder %s3475_s23, 0 }
  0x56   : > { %s3139_s20 = sand.u32 (!%p3479_p6), 1, %s2941_s16   ;;  %p3480_p4 = scmp.ne.s32.totalorder (!%p3479_p6), %s3473_s21, 0 }
  0x57   : > { %217 = sbr.rel (%p3479_p6) target bundleno = 3069 (0xbfd), region = 36  ;;  %s2385_s26 = sshll.u32 (!%p3479_p6), %s3139_s20, 5 }
  0x58   : > { %s220_s5 = scalar_lea.sflag (!%p3479_p6), [#allocation3], %s3139_s20  ;;  %s223_s30 = scalar_lea.vmem (!%p3479_p6), [#allocation2], %s2385_s26 }
  0x5c   : > { %2920 = dma.done.wait (%p3480_p4), %s220_s5, 512  }
  0x5d   : > { %2922 = vsyncadd (%p3480_p4), %s220_s5, 4294966784  ;;  %p3481_p8 = scmp.eq.s32.totalorder %s3013_s19, 0 }
  0x5f   : > { %2924 = dma.done.wait (%p3481_p8), [#allocation6], 2048   ;;  %p3482_p3 = pmov %p3481_p8 }
  0x61   : > { %2926 = vsyncadd (%p3482_p3), [#allocation6], 4294965248  ;;  %p3483_p11 = pmov %p3482_p3 }
  0x62   : > { %p3484_p5 = pmov %p3482_p3 }
  0x63   : > { %2928 = dma.done.wait (%p3483_p11), [#allocation9], 256  }
  0x64   : > { %2930 = vsyncadd (%p3484_p5), [#allocation9], 4294967040  ;;  %vm267_vm0 = vcmask 261120   ;;  %v261_v0 = vld [vmem:[%s223_s30] sm:$0xff]  ;;  %v263_v1 = vld [vmem:[%s223_s30 + $0x10] sm:$0xff]  ;;  %v321_v32 = vlaneseq  ;;  %s2957_s21 = smov 32  }
  0x65   : > { %v262_v2 = vld [vmem:[%s223_s30 + $0x8] sm:$0xff]  ;;  %v268_v3 = vsel %vm267_vm0, %v261_v0, 0.0  ;;  %v274_v4 = vsel %vm267_vm0, %v263_v1, 0.0  ;;  %v264_v5 = vld [vmem:[%s223_s30 + $0x18] sm:$0xff]  ;;  %v339_v29 = vld [vmem:[#allocation5 + $0x10] sm:$0xff]  ;;  %vm2959_vm1 = vmmov 0  }
  0x66   : > { %269 = vadd.xlane.f32.xlu0 %v268_v3  ;;  %275 = vadd.xlane.f32.xlu1 %v274_v4  ;;  %v271_v6 = vsel %vm267_vm0, %v262_v2, 0.0  ;;  %v277_v7 = vsel %vm267_vm0, %v264_v5, 0.0  ;;  %v340_v28 = vld [vmem:[#allocation5 + $0x18] sm:$0xff]  ;;  %v338_v30 = vld [vmem:[#allocation5 + $0x8] sm:$0xff]  ;;  %v337_v31 = vld [vmem:[#allocation5] sm:$0xff]  ;;  %v3171_v33 = vshrl.u32 %v321_v32, 7 }
  0x67   : > { %2499 = vmatprep.subr.mxu0 %v340_v28  ;;  %v3174_v35 = vld [vmem:[#allocation8] sm:$0xff]  ;;  %s2960_s23 = smov 96   ;;  %vm477_vm2 = vcmask 130048   ;;  %vm787_vm3 = vcmask 64512   ;;  %s2961_s6 = smov 64   ;;  %vm2253_vm4 = vcmask 1041409  }
  0x68   : > { %2500 = vmatpush3.msra.mxu0 %v340_v28  ;;  %v448_v34 = vsub.s32 3, %v3171_v33  ;;  %v323_v49 = vsub.s32 0, %v3171_v33  ;;  %v331_v50 = vsub.s32 1, %v3171_v33  ;;  %s2962_s7 = smov 80   ;;  %s2963_s10 = smov 112   ;;  %vm2255_vm5 = vcmask 1042434  }
  0x69   : > { %2501 = vmatprep.subr.mxu0 %v339_v29  ;;  %s2964_s12 = smov 48   ;;  %s2965_s13 = smov 16   ;;  %vm2257_vm6 = vcmask 1043459   ;;  %vm2260_vm7 = vcmask 257024  }
  0x6a   : > { %272 = vadd.xlane.f32.xlu0 %v271_v6  ;;  %278 = vadd.xlane.f32.xlu1 %v277_v7  ;;  %v449_v36 = vrot.slane %v3174_v35, %v448_v34  ;;  %v324_v51 = vrot.slane %v3174_v35, %v323_v49  ;;  %v332_v54 = vrot.slane %v3174_v35, %v331_v50  ;;  %s2389_s14 = sshll.u32 %s3139_s20, 2  ;;  %s2431_s8 = sshll.u32 %s3013_s19, 6 }
  0x6b   : > { %2502 = vmatpush3.msra.mxu0 %v339_v29  ;;  %s259_s29 = scalar_lea.vmem [#allocation10], %s2389_s14  ;;  %s3427_s26 = scalar_lea.hbm %s3468_s4, %s2431_s8 }
  0x6c   : > { %2503 = vmatprep.subr.mxu0 %v338_v30  ;;  %s2276_s9 = sshll.u32 %s259_s29, 4  ;;  %s2263_s5 = scalar_lea.sflag [#allocation4], %s3139_s20  ;;  %s2277_s9 = int_to_ptr.vmem [resolvable:$true] %s2276_s9 }
  0x6d   : > { %2504 = vmatpush3.msra.mxu0 %v338_v30  ;;  %s2877_s30 = scalar_lea.vmem %s2277_s9, 64  ;;  %p3485_p1 = scmp.ne.s32.totalorder %s3477_s28, 0 }
  0x6e   : > { %2505 = vmatprep.subr.mxu0 %v337_v31  ;;  %p2878_p7 = scmp.ne.s32.totalorder %s2277_s9, %s2877_s30  ;;  %s2966_s19 = smov [#allocation10]  }
  0x6f   : > { %2506 = vmatpush3.msra.mxu0 %v337_v31 }
  0x70   : > { %p2879_p12 = pnand %p2878_p7, %p3485_p1 }
  0x72   : > { %p2880_p9 = pneg %p2879_p12 }
  0xef   : > { %v270_v8 = vpop.xlane.xlu0 %269  ;;  %v276_v9 = vpop.xlane.xlu1 %275 }
  0xf0   : > { %v281_v10 = vmul.f32 0.03125, %v270_v8  ;;  %v283_v11 = vmul.f32 0.03125, %v276_v9 }
  0xf2   : > { %v285_v12 = vsub.f32 %v261_v0, %v281_v10  ;;  %v3159_v13 = vsub.f32 %v263_v1, %v283_v11 }
  0xf3   : > { %v273_v14 = vpop.xlane.xlu0 %272  ;;  %v279_v15 = vpop.xlane.xlu1 %278 }
  0xf4   : > { %v282_v16 = vmul.f32 0.03125, %v273_v14  ;;  %v284_v17 = vmul.f32 0.03125, %v279_v15  ;;  %v289_v18 = vmul.f32 %v285_v12, %v285_v12  ;;  %v291_v19 = vmul.f32 %v3159_v13, %v3159_v13 }
  0xf5   : > { %v440_v15 = vsub.s32 2, %v3171_v33 }
  0xf6   : > { %v286_v20 = vsub.f32 %v262_v2, %v282_v16  ;;  %v3163_v21 = vsub.f32 %v264_v5, %v284_v17  ;;  %v293_v22 = vsel %vm267_vm0, %v289_v18, 0.0  ;;  %v299_v23 = vsel %vm267_vm0, %v291_v19, 0.0 }
  0xf7   : > { %294 = vadd.xlane.f32.xlu0 %v293_v22  ;;  %v2958_v5 = vmov 0.0   ;;  %v441_v16 = vrot.slane %v3174_v35, %v440_v15 }
  0xf8   : > { %v290_v24 = vmul.f32 %v286_v20, %v286_v20  ;;  %v292_v25 = vmul.f32 %v3163_v21, %v3163_v21  ;;  %2513 = vmatprep.subr.mxu1 %v2958_v5  ;;  %2528 = vmatprep.subr.mxu0 %v2958_v5 }
  0xf9   : > { %2515 = vmatprep.mubr.msk.f32.mxu1 %vm2959_vm1, %v2958_v5 }
  0xfa   : > { %v296_v26 = vsel %vm267_vm0, %v290_v24, 0.0  ;;  %v302_v27 = vsel %vm267_vm0, %v292_v25, 0.0 }
  0xfb   : > { %300 = vadd.xlane.f32.xlu0 %v299_v23  ;;  %297 = vadd.xlane.f32.xlu1 %v296_v26 }
  0xff   : > { %303 = vadd.xlane.f32.xlu1 %v302_v27 }
 0x111   : > { %451 = vrot.lane.b32.xlu0 %v449_v36, %s2957_s21  ;;  %s2881_s21 = sshll.u32 %s2966_s19, 4  ;;  %s2882_s21 = int_to_ptr.vmem [resolvable:$false] %s2881_s21 }
 0x112   : > { %p2884_p13 = scmp.lt.s32.totalorder %s2277_s9, %s2882_s21 }
 0x180   : > { %v295_v37 = vpop.xlane.xlu0 %294 }
 0x181   : > { %v305_v38 = vmul.f32 0.03125, %v295_v37 }
 0x183   : > { %v309_v39 = vadd.f32 1e-05, %v305_v38 }
 0x184   : > { %v298_v40 = vpop.xlane.xlu1 %297  ;;  %v301_v41 = vpop.xlane.xlu0 %300 }
 0x185   : > { %2723 = vrsqrt.f32 %v309_v39  ;;  %v306_v42 = vmul.f32 0.03125, %v298_v40  ;;  %v307_v43 = vmul.f32 0.03125, %v301_v41 }
 0x187   : > { %v310_v44 = vadd.f32 1e-05, %v306_v42  ;;  %v311_v45 = vadd.f32 1e-05, %v307_v43  ;;  %v460_v42 = vsub.s32 4, %v3171_v33 }
 0x188   : > { %v304_v46 = vpop.xlane.xlu1 %303  ;;  %v452_v7 = vpop.permute.xlu0 %451 }
 0x189   : > { %2725 = vrsqrt.f32 %v310_v44  ;;  %v308_v47 = vmul.f32 0.03125, %v304_v46  ;;  %v461_v44 = vrot.slane %v3174_v35, %v460_v42 }
 0x18a   : > { %2727 = vrsqrt.f32 %v311_v45 }
 0x18b   : > { %v312_v48 = vadd.f32 1e-05, %v308_v47 }
 0x18d   : > { %2729 = vrsqrt.f32 %v312_v48 }
 0x192   : > { %v2724_v52 = vpop.eup %2723 }
 0x193   : > { %v317_v53 = vmul.f32 %v2724_v52, %v285_v12 }
 0x195   : > { %v325_v55 = vmul.f32 %v324_v51, %v317_v53 }
 0x196   : > { %v2726_v56 = vpop.eup %2725 }
 0x197   : > { %v2728_v57 = vpop.eup %2727  ;;  %v3185_v58 = vadd.f32 %v332_v54, %v325_v55  ;;  %v318_v59 = vmul.f32 %v2726_v56, %v286_v20 }
 0x198   : > { %v319_v60 = vmul.f32 %v2728_v57, %v3159_v13 }
 0x199   : > { %2507 = vmatprep.mubr.msk.f32.mxu0 %vm267_vm0, %v3185_v58  ;;  %v326_v61 = vmul.f32 %v324_v51, %v318_v59 }
 0x19a   : > { %v2730_v62 = vpop.eup %2729  ;;  %v327_v63 = vmul.f32 %v324_v51, %v319_v60 }
 0x19b   : > { %v3190_v0 = vadd.f32 %v332_v54, %v326_v61  ;;  %v320_v1 = vmul.f32 %v2730_v62, %v3163_v21 }
 0x19c   : > { %v3193_v2 = vadd.f32 %v332_v54, %v327_v63 }
 0x19d   : > { %2508 = vmatmul.mubr.msk.f32.vlgmr.msra.gmra.mxu0 %vm267_vm0, %v3190_v0  ;;  %v328_v3 = vmul.f32 %v324_v51, %v320_v1 }
 0x19e   : > { %2510 = vmatprep.mubr.msk.f32.mxu0 %vm267_vm0, %v3193_v2 }
 0x19f   : > { %v3199_v4 = vadd.f32 %v332_v54, %v328_v3 }
 0x1a1   : > { %2511 = vmatmul.mubr.msk.f32.gmra.mxu0 %vm267_vm0, %v3199_v4 }
 0x1a2   : > { %2530 = vmatprep.mubr.msk.f32.mxu0 %vm2959_vm1, %v2958_v5 }
 0x25d   : > { %v3209_v6 = vpop.f32.mrf.mxu0 }
 0x25e   : > { %v3224_v12 = vadd.f32 %v3209_v6, %v452_v7  ;;  %v443_v20 = vadd.f32 %v3209_v6, %v441_v16 }
 0x25f   : > { %v3211_v8 = vpop.f32.mrf.mxu0 }
 0x260   : > { %v3214_v9 = vadd.f32 %v452_v7, %v3211_v8  ;;  %v442_v17 = vadd.f32 %v441_v16, %v3211_v8  ;;  %v3251_v25 = vmul.f32 0.25, %v443_v20 }
 0x261   : > { %v3216_v10 = vpop.f32.mrf.mxu0 }
 0x262   : > { %v3219_v11 = vadd.f32 %v3216_v10, %v452_v7  ;;  %475 = vrot.lane.b32.xlu1 %v3214_v9, %s2960_s23  ;;  %v445_v18 = vadd.f32 %v3216_v10, %v441_v16  ;;  %v3239_v21 = vmul.f32 0.25, %v442_v17 }
 0x263   : > { %v3226_v13 = vpop.f32.mrf.mxu0 }
 0x264   : > { %710 = vrot.lane.b32.xlu0 %v3219_v11, %s2960_s23  ;;  %v3230_v14 = vadd.f32 %v452_v7, %v3226_v13  ;;  %v3243_v23 = vmul.f32 0.25, %v445_v18  ;;  %v444_v26 = vadd.f32 %v441_v16, %v3226_v13 }
 0x266   : > { %554 = vrot.lane.b32.xlu1 %v3224_v12, %s2960_s23  ;;  %v3264_v28 = vmul.f32 0.25, %v444_v26 }
 0x26a   : > { %632 = vrot.lane.b32.xlu1 %v3230_v14, %s2960_s23  ;;  %s2883_s23 = scalar_lea.vmem %s2882_s21, 128 }
 0x26b   : > { %p2885_p0 = scmp.lt.s32.totalorder %s2883_s23, %s2877_s30 }
 0x26d   : > { %p2886_p2 = por %p2885_p0, %p2884_p13 }
 0x26f   : > { %p2887_p10 = pnand %p2886_p2, %p2880_p9 }
 0x2d4   : > { %v476_v19 = vpop.permute.xlu1 %475 }
 0x2d5   : > { %2514 = vmatpush3.xpose.msk.msra.mxu1 %vm477_vm2, %v476_v19 }
 0x2d6   : > { %v711_v22 = vpop.permute.xlu0 %710  ;;  %2518 = vmatprep.subr.mxu1 %v2958_v5 }
 0x2d7   : > { %2529 = vmatpush3.xpose.msk.msra.mxu0 %vm477_vm2, %v711_v22 }
 0x2d8   : > { %2516 = vmatmul.mubr.msk.f32.vlgmr.msra.gmra.mxu1 %vm477_vm2, %v3239_v21  ;;  %v555_v24 = vpop.permute.xlu1 %554  ;;  %2538 = vmatprep.subr.mxu0 %v2958_v5 }
 0x2d9   : > { %2519 = vmatpush3.xpose.msk.msra.mxu1 %vm477_vm2, %v555_v24  ;;  %2520 = vmatprep.mubr.msk.f32.mxu1 %vm2959_vm1, %v2958_v5 }
 0x2da   : > { %2531 = vmatmul.mubr.msk.f32.vlgmr.msra.gmra.mxu0 %vm477_vm2, %v3243_v23  ;;  %2523 = vmatprep.subr.mxu1 %v2958_v5 }
 0x2db   : > { %2540 = vmatprep.mubr.msk.f32.mxu0 %vm2959_vm1, %v2958_v5 }
 0x2dc   : > { %2521 = vmatmul.mubr.msk.f32.vlgmr.msra.gmra.mxu1 %vm477_vm2, %v3251_v25  ;;  %v633_v27 = vpop.permute.xlu1 %632 }
 0x2dd   : > { %2524 = vmatpush3.xpose.msk.msra.mxu1 %vm477_vm2, %v633_v27  ;;  %2525 = vmatprep.mubr.msk.f32.mxu1 %vm2959_vm1, %v2958_v5 }
 0x2de   : > { %2533 = vmatprep.subr.mxu1 %v2958_v5 }
 0x2e0   : > { %2526 = vmatmul.mubr.msk.f32.vlgmr.msra.gmra.mxu1 %vm477_vm2, %v3264_v28 }
 0x2e1   : > { %2535 = vmatprep.mubr.msk.f32.mxu1 %vm2959_vm1, %v2958_v5 }
 0x398   : > { %v549_v29 = vpop.f32.mrf.mxu1 }
 0x399   : > { %v788_v30 = vsel %vm787_vm3, %v549_v29, -inf }
 0x39a   : > { %v783_v31 = vpop.f32.mrf.mxu0  ;;  %789 = vmax.xlane.f32.xlu1 %v788_v30  ;;  %v2517_v32 = vpop.f32.mrf.mxu1 }
 0x39b   : > { %v797_v43 = vsel %vm787_vm3, %v783_v31, -inf }
 0x39c   : > { %v627_v34 = vpop.f32.mrf.mxu1  ;;  %v2532_v36 = vpop.f32.mrf.mxu0 }
 0x39d   : > { %v791_v37 = vsel %vm787_vm3, %v627_v34, -inf }
 0x39e   : > { %792 = vmax.xlane.f32.xlu0 %v791_v37  ;;  %v2522_v38 = vpop.f32.mrf.mxu1 }
 0x3a0   : > { %v705_v39 = vpop.f32.mrf.mxu1 }
 0x3a1   : > { %v794_v40 = vsel %vm787_vm3, %v705_v39, -inf }
 0x3a2   : > { %795 = vmax.xlane.f32.xlu0 %v794_v40  ;;  %v2527_v41 = vpop.f32.mrf.mxu1 }
 0x3a6   : > { %798 = vmax.xlane.f32.xlu0 %v797_v43 }
 0x3ab   : > { %463 = vrot.lane.b32.xlu1 %v461_v44, %s2961_s6 }
 0x423   : > { %v790_v45 = vpop.xlane.xlu1 %789 }
 0x424   : > { %v800_v46 = vsub.f32 %v549_v29, %v790_v45 }
 0x426   : > { %v804_v47 = vmul.f32 1.442695, %v800_v46 }
 0x427   : > { %v793_v48 = vpop.xlane.xlu0 %792  ;;  %v464_v51 = vpop.permute.xlu1 %463 }
 0x428   : > { %2731 = vpow2.f32 %v804_v47  ;;  %v3279_v52 = vadd.f32 %v464_v51, %v3211_v8  ;;  %v3284_v54 = vadd.f32 %v464_v51, %v3226_v13  ;;  %v801_v55 = vsub.f32 %v627_v34, %v793_v48 }
 0x429   : > { %v3289_v59 = vadd.f32 %v3216_v10, %v464_v51  ;;  %v3304_v15 = vadd.f32 %v3209_v6, %v464_v51 }
 0x42a   : > { %833 = vrot.lane.b32.xlu1 %v3279_v52, %s2961_s6  ;;  %v806_v60 = vmul.f32 1.442695, %v801_v55 }
 0x42b   : > { %v796_v53 = vpop.xlane.xlu0 %795 }
 0x42c   : > { %v802_v61 = vsub.f32 %v705_v39, %v796_v53 }
 0x42e   : > { %987 = vrot.lane.b32.xlu1 %v3284_v54, %s2961_s6  ;;  %v808_v1 = vmul.f32 1.442695, %v802_v61 }
 0x42f   : > { %v799_v56 = vpop.xlane.xlu0 %798 }
 0x430   : > { %v803_v57 = vsub.f32 %v783_v31, %v799_v56 }
 0x432   : > { %v810_v62 = vmul.f32 1.442695, %v803_v57  ;;  %1064 = vrot.lane.b32.xlu1 %v3289_v59, %s2961_s6 }
 0x434   : > { %2733 = vpow2.f32 %v810_v62 }
 0x435   : > { %v2732_v63 = vpop.eup %2731  ;;  %2735 = vpow2.f32 %v806_v60 }
 0x436   : > { %1142 = vrot.lane.b32.xlu1 %v3214_v9, %s2962_s7  ;;  %v812_v3 = vsel %vm787_vm3, %v2732_v63, 0.0  ;;  %2737 = vpow2.f32 %v808_v1 }
 0x437   : > { %813 = vadd.xlane.f32.xlu0 %v812_v3 }
 0x43a   : > { %1220 = vrot.lane.b32.xlu1 %v3224_v12, %s2962_s7 }
 0x43e   : > { %1140 = vrot.lane.b32.xlu1 %v3239_v21, %s2963_s10 }
 0x441   : > { %v2734_v7 = vpop.eup %2733 }
 0x442   : > { %1218 = vrot.lane.b32.xlu1 %v3251_v25, %s2963_s10  ;;  %v821_v8 = vsel %vm787_vm3, %v2734_v7, 0.0  ;;  %v2736_v10 = vpop.eup %2735 }
 0x443   : > { %822 = vadd.xlane.f32.xlu0 %v821_v8  ;;  %v815_v9 = vsel %vm787_vm3, %v2736_v10, 0.0  ;;  %v2738_v13 = vpop.eup %2737 }
 0x444   : > { %v818_v12 = vsel %vm787_vm3, %v2738_v13, 0.0 }
 0x446   : > { %1376 = vrot.lane.b32.xlu1 %v3219_v11, %s2962_s7 }
 0x447   : > { %816 = vadd.xlane.f32.xlu0 %v815_v9 }
 0x44a   : > { %1374 = vrot.lane.b32.xlu1 %v3243_v23, %s2963_s10 }
 0x44b   : > { %819 = vadd.xlane.f32.xlu0 %v818_v12 }
 0x461   : > { %910 = vrot.lane.b32.xlu0 %v3304_v15, %s2961_s6 }
 0x465   : > { %1298 = vrot.lane.b32.xlu0 %v3230_v14, %s2962_s7 }
 0x469   : > { %1296 = vrot.lane.b32.xlu0 %v3264_v28, %s2963_s10 }
 0x49c   : > { %v834_v11 = vpop.permute.xlu1 %833 }
 0x49d   : > { %2534 = vmatpush3.msra.mxu1 %v834_v11 }
 0x49e   : > { %2543 = vmatprep.subr.mxu1 %v2958_v5 }
 0x4a0   : > { %v988_v17 = vpop.permute.xlu1 %987 }
 0x4a4   : > { %v1065_v18 = vpop.permute.xlu1 %1064 }
 0x4a8   : > { %v1143_v21 = vpop.permute.xlu1 %1142 }
 0x4ac   : > { %v1221_v14 = vpop.permute.xlu1 %1220 }
 0x4b0   : > { %v1141_v25 = vpop.permute.xlu1 %1140 }
 0x4b4   : > { %v1219_v29 = vpop.permute.xlu1 %1218 }
 0x4b8   : > { %v1377_v34 = vpop.permute.xlu1 %1376 }
 0x4bc   : > { %v1375_v37 = vpop.permute.xlu1 %1374 }
 0x4c0   : > { %v814_v16 = vpop.xlane.xlu0 %813 }
 0x4c1   : > { %2739 = vrcp.f32 %v814_v16 }
 0x4cc   : > { %v823_v19 = vpop.xlane.xlu0 %822 }
 0x4ce   : > { %v2740_v20 = vpop.eup %2739 }
 0x4cf   : > { %v828_v6 = vmul.f32 %v2740_v20, %v2732_v63 }
 0x4d0   : > { %v817_v22 = vpop.xlane.xlu0 %816 }
 0x4d1   : > { %2741 = vrcp.f32 %v817_v22  ;;  %2536 = vmatmul.mubr.msk.f32.vlgmr.msra.gmra.mxu1 %vm787_vm3, %v828_v6 }
 0x4d2   : > { %2544 = vmatpush3.msra.mxu1 %v988_v17  ;;  %2545 = vmatprep.mubr.msk.f32.mxu1 %vm2959_vm1, %v2958_v5  ;;  %2743 = vrcp.f32 %v823_v19 }
 0x4d3   : > { %2553 = vmatprep.subr.mxu1 %v2958_v5 }
 0x4d4   : > { %v820_v23 = vpop.xlane.xlu0 %819 }
 0x4d5   : > { %2745 = vrcp.f32 %v820_v23 }
 0x4d8   : > { %v911_v24 = vpop.permute.xlu0 %910 }
 0x4d9   : > { %2539 = vmatpush3.msra.mxu0 %v911_v24 }
 0x4da   : > { %2548 = vmatprep.subr.mxu0 %v2958_v5 }
 0x4dc   : > { %v1299_v36 = vpop.permute.xlu0 %1298 }
 0x4de   : > { %v2742_v26 = vpop.eup %2741 }
 0x4df   : > { %v829_v27 = vmul.f32 %v2742_v26, %v2736_v10  ;;  %v2744_v28 = vpop.eup %2743 }
 0x4e0   : > { %v831_v32 = vmul.f32 %v2744_v28, %v2734_v7  ;;  %v1297_v38 = vpop.permute.xlu0 %1296 }
 0x4e1   : > { %2541 = vmatmul.mubr.msk.f32.vlgmr.msra.gmra.mxu0 %vm787_vm3, %v829_v27 }
 0x4e2   : > { %v2746_v30 = vpop.eup %2745  ;;  %2549 = vmatpush3.msra.mxu0 %v1065_v18  ;;  %2550 = vmatprep.mubr.msk.f32.mxu0 %vm2959_vm1, %v2958_v5 }
 0x4e3   : > { %2558 = vmatprep.subr.mxu0 %v2958_v5  ;;  %v830_v31 = vmul.f32 %v2746_v30, %v2738_v13 }
 0x4e5   : > { %2546 = vmatmul.mubr.msk.f32.vlgmr.msra.gmra.mxu1 %vm787_vm3, %v830_v31  ;;  %2551 = vmatmul.mubr.msk.f32.vlgmr.msra.gmra.mxu0 %vm787_vm3, %v831_v32 }
 0x4e6   : > { %2554 = vmatpush3.xpose.msk.msra.mxu1 %vm477_vm2, %v1143_v21  ;;  %2559 = vmatpush3.xpose.msk.msra.mxu0 %vm477_vm2, %v1221_v14 }
 0x4e7   : > { %2555 = vmatprep.mubr.msk.f32.mxu1 %vm2959_vm1, %v2958_v5  ;;  %2560 = vmatprep.mubr.msk.f32.mxu0 %vm2959_vm1, %v2958_v5 }
 0x4e8   : > { %2563 = vmatprep.subr.mxu1 %v2958_v5  ;;  %2568 = vmatprep.subr.mxu0 %v2958_v5 }
 0x4e9   : > { %2556 = vmatmul.mubr.msk.f32.vlgmr.msra.gmra.mxu1 %vm477_vm2, %v1141_v25  ;;  %2561 = vmatmul.mubr.msk.f32.vlgmr.msra.gmra.mxu0 %vm477_vm2, %v1219_v29 }
 0x4ea   : > { %2564 = vmatpush3.xpose.msk.msra.mxu1 %vm477_vm2, %v1299_v36  ;;  %2569 = vmatpush3.xpose.msk.msra.mxu0 %vm477_vm2, %v1377_v34 }
 0x4eb   : > { %2565 = vmatprep.mubr.msk.f32.mxu1 %vm2959_vm1, %v2958_v5  ;;  %2570 = vmatprep.mubr.msk.f32.mxu0 %vm2959_vm1, %v2958_v5 }
 0x4ec   : > { %2578 = vmatprep.subr.mxu0 %v2958_v5  ;;  %2573 = vmatprep.subr.mxu1 %v2958_v5 }
 0x4ed   : > { %2566 = vmatmul.mubr.msk.f32.vlgmr.msra.gmra.mxu1 %vm477_vm2, %v1297_v38  ;;  %2571 = vmatmul.mubr.msk.f32.vlgmr.msra.gmra.mxu0 %vm477_vm2, %v1375_v37 }
 0x4ee   : > { %2575 = vmatprep.mubr.msk.f32.mxu1 %vm2959_vm1, %v2958_v5  ;;  %2580 = vmatprep.mubr.msk.f32.mxu0 %vm2959_vm1, %v2958_v5 }
 0x591   : > { %v3346_v39 = vpop.f32.mrf.mxu1 }
 0x593   : > { %v2537_v40 = vpop.f32.mrf.mxu1 }
 0x5a1   : > { %v3348_v41 = vpop.f32.mrf.mxu0 }
 0x5a3   : > { %v2542_v42 = vpop.f32.mrf.mxu0 }
 0x5a4   : > { %v1823_v42 = vld [vmem:[#allocation7 + $0x18] sm:$0xff] }
 0x5a5   : > { %v3350_v43 = vpop.f32.mrf.mxu1  ;;  %v3352_v44 = vpop.f32.mrf.mxu0 }
 0x5a7   : > { %v2547_v45 = vpop.f32.mrf.mxu1  ;;  %v2552_v46 = vpop.f32.mrf.mxu0 }
 0x5a8   : > { %v1822_v45 = vld [vmem:[#allocation7 + $0x10] sm:$0xff]  ;;  %v1821_v46 = vld [vmem:[#allocation7 + $0x8] sm:$0xff] }
 0x5a9   : > { %v1214_v47 = vpop.f32.mrf.mxu1  ;;  %v1292_v48 = vpop.f32.mrf.mxu0 }
 0x5aa   : > { %v1452_v51 = vsel %vm787_vm3, %v1214_v47, -inf  ;;  %v1455_v53 = vsel %vm787_vm3, %v1292_v48, -inf }
 0x5ab   : > { %1453 = vmax.xlane.f32.xlu0 %v1452_v51  ;;  %v2557_v55 = vpop.f32.mrf.mxu1  ;;  %1456 = vmax.xlane.f32.xlu1 %v1455_v53  ;;  %v2562_v56 = vpop.f32.mrf.mxu0 }
 0x5ad   : > { %v1370_v57 = vpop.f32.mrf.mxu1  ;;  %v1448_v60 = vpop.f32.mrf.mxu0 }
 0x5ae   : > { %v1458_v61 = vsel %vm787_vm3, %v1370_v57, -inf  ;;  %v1461_v1 = vsel %vm787_vm3, %v1448_v60, -inf }
 0x5af   : > { %1459 = vmax.xlane.f32.xlu0 %v1458_v61  ;;  %v2567_v62 = vpop.f32.mrf.mxu1  ;;  %v2572_v63 = vpop.f32.mrf.mxu0 }
 0x5b3   : > { %1462 = vmax.xlane.f32.xlu0 %v1461_v1 }
 0x634   : > { %v1454_v3 = vpop.xlane.xlu0 %1453  ;;  %v1457_v7 = vpop.xlane.xlu1 %1456 }
 0x635   : > { %v1464_v8 = vsub.f32 %v1214_v47, %v1454_v3  ;;  %v1465_v10 = vsub.f32 %v1292_v48, %v1457_v7 }
 0x637   : > { %v1468_v9 = vmul.f32 1.442695, %v1464_v8  ;;  %v1470_v13 = vmul.f32 1.442695, %v1465_v10 }
 0x638   : > { %v1460_v12 = vpop.xlane.xlu0 %1459 }
 0x639   : > { %2747 = vpow2.f32 %v1468_v9  ;;  %v1466_v11 = vsub.f32 %v1370_v57, %v1460_v12 }
 0x63a   : > { %2749 = vpow2.f32 %v1470_v13 }
 0x63b   : > { %v1472_v16 = vmul.f32 1.442695, %v1466_v11 }
 0x63c   : > { %v1463_v22 = vpop.xlane.xlu0 %1462 }
 0x63d   : > { %2751 = vpow2.f32 %v1472_v16  ;;  %v1467_v14 = vsub.f32 %v1448_v60, %v1463_v22 }
 0x63f   : > { %v1474_v23 = vmul.f32 1.442695, %v1467_v14 }
 0x641   : > { %2753 = vpow2.f32 %v1474_v23 }
 0x646   : > { %v2748_v17 = vpop.eup %2747 }
 0x647   : > { %v2750_v18 = vpop.eup %2749  ;;  %v1476_v19 = vsel %vm787_vm3, %v2748_v17, 0.0 }
 0x648   : > { %1477 = vadd.xlane.f32.xlu0 %v1476_v19  ;;  %v1479_v20 = vsel %vm787_vm3, %v2750_v18, 0.0 }
 0x649   : > { %1480 = vadd.xlane.f32.xlu1 %v1479_v20 }
 0x64a   : > { %v2752_v21 = vpop.eup %2751 }
 0x64b   : > { %v1482_v6 = vsel %vm787_vm3, %v2752_v21, 0.0 }
 0x64c   : > { %1483 = vadd.xlane.f32.xlu0 %v1482_v6 }
 0x64e   : > { %v2754_v24 = vpop.eup %2753 }
 0x64f   : > { %v1485_v25 = vsel %vm787_vm3, %v2754_v24, 0.0 }
 0x65a   : > { %1572 = vrot.lane.b32.xlu1 %v3304_v15, %s2964_s12 }
 0x65e   : > { %1648 = vrot.lane.b32.xlu1 %v3284_v54, %s2964_s12 }
 0x662   : > { %1496 = vrot.lane.b32.xlu0 %v3279_v52, %s2964_s12 }
 0x682   : > { %1486 = vadd.xlane.f32.xlu1 %v1485_v25 }
 0x693   : > { %1724 = vrot.lane.b32.xlu1 %v3289_v59, %s2964_s12 }
 0x6d1   : > { %v1478_v26 = vpop.xlane.xlu0 %1477 }
 0x6d2   : > { %2755 = vrcp.f32 %v1478_v26  ;;  %v1481_v27 = vpop.xlane.xlu1 %1480 }
 0x6d3   : > { %2757 = vrcp.f32 %v1481_v27 }
 0x6d5   : > { %v1484_v28 = vpop.xlane.xlu0 %1483 }
 0x6d6   : > { %2759 = vrcp.f32 %v1484_v28  ;;  %v1573_v15 = vpop.permute.xlu1 %1572 }
 0x6d7   : > { %2579 = vmatpush3.msra.mxu0 %v1573_v15 }
 0x6d8   : > { %2588 = vmatprep.subr.mxu0 %v2958_v5 }
 0x6d9   : > { %v1497_v52 = vpop.permute.xlu0 %1496 }
 0x6da   : > { %2574 = vmatpush3.msra.mxu1 %v1497_v52  ;;  %v1649_v32 = vpop.permute.xlu1 %1648 }
 0x6db   : > { %2583 = vmatprep.subr.mxu1 %v2958_v5 }
 0x6df   : > { %v2756_v54 = vpop.eup %2755 }
 0x6e0   : > { %v2758_v29 = vpop.eup %2757  ;;  %v1492_v30 = vmul.f32 %v2756_v54, %v2748_v17  ;;  %v2001_v54 = vld [vmem:[#allocation7 + $0x38] sm:$0xff] }
 0x6e1   : > { %v1493_v31 = vmul.f32 %v2758_v29, %v2750_v18  ;;  %v1999_v29 = vld [vmem:[#allocation7 + $0x28] sm:$0xff] }
 0x6e2   : > { %2576 = vmatmul.mubr.msk.f32.vlgmr.msra.gmra.mxu1 %vm787_vm3, %v1492_v30  ;;  %v1998_v30 = vld [vmem:[#allocation7 + $0x20] sm:$0xff] }
 0x6e3   : > { %v2760_v59 = vpop.eup %2759  ;;  %2581 = vmatmul.mubr.msk.f32.vlgmr.msra.gmra.mxu0 %vm787_vm3, %v1493_v31  ;;  %2584 = vmatpush3.msra.mxu1 %v1649_v32 }
 0x6e4   : > { %2585 = vmatprep.mubr.msk.f32.mxu1 %vm2959_vm1, %v2958_v5  ;;  %v1494_v34 = vmul.f32 %v2760_v59, %v2752_v21  ;;  %2590 = vmatprep.mubr.msk.f32.mxu0 %vm2959_vm1, %v2958_v5  ;;  %v1820_v5 = vld [vmem:[#allocation7] sm:$0xff] }
 0x6e5   : > { %2593 = vmatprep.subr.mxu1 %v1823_v42 }
 0x6e6   : > { %2586 = vmatmul.mubr.msk.f32.vlgmr.msra.gmra.mxu1 %vm787_vm3, %v1494_v34 }
 0x6e7   : > { %2594 = vmatpush3.msra.mxu1 %v1823_v42 }
 0x6e8   : > { %2595 = vmatprep.subr.mxu1 %v1822_v45 }
 0x6e9   : > { %2596 = vmatpush3.msra.mxu1 %v1822_v45 }
 0x6ea   : > { %2597 = vmatprep.subr.mxu1 %v1821_v46 }
 0x6eb   : > { %2598 = vmatpush3.msra.mxu1 %v1821_v46 }
 0x6ec   : > { %2599 = vmatprep.subr.mxu1 %v1820_v5 }
 0x6ed   : > { %2600 = vmatpush3.msra.mxu1 %v1820_v5 }
 0x70b   : > { %v1487_v36 = vpop.xlane.xlu1 %1486 }
 0x70c   : > { %2761 = vrcp.f32 %v1487_v36 }
 0x70f   : > { %v1725_v37 = vpop.permute.xlu1 %1724 }
 0x710   : > { %2589 = vmatpush3.msra.mxu0 %v1725_v37 }
 0x711   : > { %2607 = vmatprep.subr.mxu0 %v2001_v54 }
 0x719   : > { %v2762_v38 = vpop.eup %2761 }
 0x71a   : > { %v1495_v40 = vmul.f32 %v2762_v38, %v2754_v24 }
 0x71c   : > { %2591 = vmatmul.mubr.msk.f32.vlgmr.msra.gmra.mxu0 %vm787_vm3, %v1495_v40 }
 0x71d   : > { %2608 = vmatpush3.msra.mxu0 %v2001_v54 }
 0x7a2   : > { %v1568_v47 = vpop.f32.mrf.mxu1 }
 0x7a3   : > { %v1644_v48 = vpop.f32.mrf.mxu0  ;;  %1804 = vrot.lane.b32.xlu0 %v1568_v47, %s2965_s13 }
 0x7a4   : > { %1806 = vrot.lane.b32.xlu1 %v1644_v48, %s2965_s13  ;;  %v2577_v51 = vpop.f32.mrf.mxu1 }
 0x7a5   : > { %v2582_v53 = vpop.f32.mrf.mxu0 }
 0x7a6   : > { %v1720_v55 = vpop.f32.mrf.mxu1 }
 0x7a7   : > { %1808 = vrot.lane.b32.xlu0 %v1720_v55, %s2965_s13  ;;  %v1983_v55 = vsub.s32 6, %v3171_v33 }
 0x7a8   : > { %v2587_v56 = vpop.f32.mrf.mxu1 }
 0x7dc   : > { %v1796_v57 = vpop.f32.mrf.mxu0 }
 0x7dd   : > { %1810 = vrot.lane.b32.xlu1 %v1796_v57, %s2965_s13  ;;  %v1984_v57 = vrot.slane %v3174_v35, %v1983_v55 }
 0x7de   : > { %v2592_v60 = vpop.f32.mrf.mxu0 }
 0x7df   : > { %v1991_v60 = vsub.s32 7, %v3171_v33 }
 0x815   : > { %v1805_v61 = vpop.permute.xlu0 %1804 }
 0x816   : > { %v1816_v62 = vsel %vm477_vm2, %v3346_v39, %v1805_v61  ;;  %v1807_v63 = vpop.permute.xlu1 %1806  ;;  %v1826_v39 = vsub.s32 5, %v3171_v33 }
 0x817   : > { %v1817_v1 = vsel %vm477_vm2, %v3348_v41, %v1807_v63  ;;  %2601 = vmatprep.mubr.msk.f32.mxu1 %vm267_vm0, %v1816_v62 }
 0x818   : > { %2602 = vmatmul.mubr.msk.f32.vlgmr.msra.gmra.mxu1 %vm267_vm0, %v1817_v1  ;;  %v1827_v41 = vrot.slane %v3174_v35, %v1826_v39  ;;  %v1992_v1 = vrot.slane %v3174_v35, %v1991_v60 }
 0x819   : > { %v1809_v3 = vpop.permute.xlu0 %1808 }
 0x81a   : > { %v1818_v7 = vsel %vm477_vm2, %v3350_v43, %v1809_v3 }
 0x81b   : > { %2604 = vmatprep.mubr.msk.f32.mxu1 %vm267_vm0, %v1818_v7 }
 0x84f   : > { %v1811_v8 = vpop.permute.xlu1 %1810 }
 0x850   : > { %v1819_v10 = vsel %vm477_vm2, %v3352_v44, %v1811_v8 }
 0x851   : > { %2605 = vmatmul.mubr.msk.f32.gmra.mxu1 %vm267_vm0, %v1819_v10 }
 0x8d8   : > { %v2603_v9 = vpop.f32.mrf.mxu1 }
 0x8d9   : > { %v1912_v13 = vadd.f32 %v2603_v9, %v1827_v41 }
 0x8da   : > { %v1906_v12 = vpop.f32.mrf.mxu1 }
 0x8db   : > { %v1907_v11 = vadd.f32 %v1906_v12, %v1827_v41  ;;  %v1926_v16 = vadd.f32 %v1912_v13, %v3190_v0 }
 0x8dd   : > { %v1932_v43 = vsel %vm267_vm0, %v1926_v16, 0.0  ;;  %v1925_v17 = vadd.f32 %v1907_v11, %v3185_v58 }
 0x8de   : > { %1933 = vadd.xlane.f32.xlu1 %v1932_v43 }
 0x8df   : > { %v1929_v18 = vsel %vm267_vm0, %v1925_v17, 0.0 }
 0x8e0   : > { %1930 = vadd.xlane.f32.xlu0 %v1929_v18 }
 0x911   : > { %v2606_v44 = vpop.f32.mrf.mxu1 }
 0x912   : > { %v1922_v20 = vadd.f32 %v2606_v44, %v1827_v41 }
 0x913   : > { %v1916_v19 = vpop.f32.mrf.mxu1 }
 0x914   : > { %v1917_v21 = vadd.f32 %v1916_v19, %v1827_v41  ;;  %v1928_v14 = vadd.f32 %v1922_v20, %v3199_v4  ;;  %v2000_v4 = vld [vmem:[#allocation7 + $0x30] sm:$0xff] }
 0x915   : > { %2609 = vmatprep.subr.mxu0 %v2000_v4 }
 0x916   : > { %v1927_v6 = vadd.f32 %v1917_v21, %v3193_v2  ;;  %v1938_v0 = vsel %vm267_vm0, %v1928_v14, 0.0  ;;  %2610 = vmatpush3.msra.mxu0 %v2000_v4  ;;  %v2111_v21 = vld [vmem:[#allocation7 + $0x58] sm:$0xff] }
 0x917   : > { %2611 = vmatprep.subr.mxu0 %v1999_v29  ;;  %2621 = vmatprep.subr.mxu1 %v2111_v21 }
 0x918   : > { %v1935_v22 = vsel %vm267_vm0, %v1927_v6, 0.0  ;;  %2612 = vmatpush3.msra.mxu0 %v1999_v29  ;;  %2622 = vmatpush3.msra.mxu1 %v2111_v21 }
 0x919   : > { %1936 = vadd.xlane.f32.xlu0 %v1935_v22  ;;  %2613 = vmatprep.subr.mxu0 %v1998_v30  ;;  %v2109_v22 = vld [vmem:[#allocation7 + $0x48] sm:$0xff] }
 0x91a   : > { %2614 = vmatpush3.msra.mxu0 %v1998_v30 }
 0x91d   : > { %1939 = vadd.xlane.f32.xlu0 %v1938_v0  ;;  %v266_v0 = vld [vmem:[#allocation8 + $0x8] sm:$0x3] }
 0x967   : > { %v1934_v23 = vpop.xlane.xlu1 %1933 }
 0x968   : > { %v1942_v58 = vmul.f32 0.03125, %v1934_v23  ;;  %v2005_v23 = vrot.slane %v266_v0, %v323_v49 }
 0x969   : > { %v1931_v24 = vpop.xlane.xlu0 %1930 }
 0x96a   : > { %v1946_v25 = vsub.f32 %v1926_v16, %v1942_v58  ;;  %v1941_v26 = vmul.f32 0.03125, %v1931_v24 }
 0x96c   : > { %v1945_v27 = vsub.f32 %v1925_v17, %v1941_v26  ;;  %v1950_v28 = vmul.f32 %v1946_v25, %v1946_v25 }
 0x96e   : > { %v1956_v15 = vsel %vm267_vm0, %v1950_v28, 0.0  ;;  %v1949_v52 = vmul.f32 %v1945_v27, %v1945_v27 }
 0x96f   : > { %1957 = vadd.xlane.f32.xlu1 %v1956_v15 }
 0x970   : > { %v1953_v2 = vsel %vm267_vm0, %v1949_v52, 0.0 }
 0x971   : > { %1954 = vadd.xlane.f32.xlu0 %v1953_v2 }
 0x9a2   : > { %v1937_v31 = vpop.xlane.xlu0 %1936 }
 0x9a3   : > { %v1943_v32 = vmul.f32 0.03125, %v1937_v31  ;;  %v2115_v31 = vrot.slane %v266_v0, %v331_v50 }
 0x9a5   : > { %v1947_v59 = vsub.f32 %v1927_v6, %v1943_v32  ;;  %v2110_v6 = vld [vmem:[#allocation7 + $0x50] sm:$0xff] }
 0x9a6   : > { %v1940_v34 = vpop.xlane.xlu0 %1939  ;;  %2623 = vmatprep.subr.mxu1 %v2110_v6 }
 0x9a7   : > { %v1944_v36 = vmul.f32 0.03125, %v1940_v34  ;;  %v1951_v37 = vmul.f32 %v1947_v59, %v1947_v59  ;;  %2624 = vmatpush3.msra.mxu1 %v2110_v6 }
 0x9a8   : > { %2625 = vmatprep.subr.mxu1 %v2109_v22 }
 0x9a9   : > { %v1948_v38 = vsub.f32 %v1928_v14, %v1944_v36  ;;  %v1959_v40 = vsel %vm267_vm0, %v1951_v37, 0.0  ;;  %v2108_v14 = vld [vmem:[#allocation7 + $0x40] sm:$0xff]  ;;  %2626 = vmatpush3.msra.mxu1 %v2109_v22 }
 0x9aa   : > { %1960 = vadd.xlane.f32.xlu0 %v1959_v40  ;;  %2627 = vmatprep.subr.mxu1 %v2108_v14 }
 0x9ab   : > { %v1952_v42 = vmul.f32 %v1948_v38, %v1948_v38  ;;  %2628 = vmatpush3.msra.mxu1 %v2108_v14 }
 0x9ad   : > { %v1962_v45 = vsel %vm267_vm0, %v1952_v42, 0.0 }
 0x9ae   : > { %1963 = vadd.xlane.f32.xlu1 %v1962_v45 }
 0x9f8   : > { %v1958_v46 = vpop.xlane.xlu1 %1957 }
 0x9f9   : > { %v1966_v5 = vmul.f32 0.03125, %v1958_v46 }
 0x9fa   : > { %v1955_v47 = vpop.xlane.xlu0 %1954 }
 0x9fb   : > { %v1970_v48 = vadd.f32 1e-05, %v1966_v5  ;;  %v1965_v51 = vmul.f32 0.03125, %v1955_v47 }
 0x9fd   : > { %2763 = vrsqrt.f32 %v1970_v48  ;;  %v1969_v53 = vadd.f32 1e-05, %v1965_v51 }
 0x9ff   : > { %2765 = vrsqrt.f32 %v1969_v53 }
 0xa0a   : > { %v2764_v56 = vpop.eup %2763 }
 0xa0b   : > { %v1978_v61 = vmul.f32 %v2764_v56, %v1946_v25 }
 0xa0c   : > { %v2766_v62 = vpop.eup %2765 }
 0xa0d   : > { %v1977_v63 = vmul.f32 %v2766_v62, %v1945_v27  ;;  %v1986_v3 = vmul.f32 %v1984_v57, %v1978_v61 }
 0xa0f   : > { %v1985_v7 = vmul.f32 %v1984_v57, %v1977_v63  ;;  %v1994_v10 = vadd.f32 %v1992_v1, %v1986_v3 }
 0xa11   : > { %v1993_v8 = vadd.f32 %v1992_v1, %v1985_v7 }
 0xa13   : > { %2615 = vmatprep.mubr.msk.f32.mxu0 %vm267_vm0, %v1993_v8 }
 0xa14   : > { %2616 = vmatmul.mubr.msk.f32.vlgmr.msra.gmra.mxu0 %vm267_vm0, %v1994_v10 }
 0xa33   : > { %v1961_v39 = vpop.xlane.xlu0 %1960 }
 0xa34   : > { %v1967_v41 = vmul.f32 0.03125, %v1961_v39 }
 0xa36   : > { %v1971_v9 = vadd.f32 1e-05, %v1967_v41 }
 0xa37   : > { %v1964_v13 = vpop.xlane.xlu1 %1963 }
 0xa38   : > { %2767 = vrsqrt.f32 %v1971_v9  ;;  %v1968_v12 = vmul.f32 0.03125, %v1964_v13 }
 0xa3a   : > { %v1972_v11 = vadd.f32 1e-05, %v1968_v12 }
 0xa3c   : > { %2769 = vrsqrt.f32 %v1972_v11 }
 0xa45   : > { %v2768_v16 = vpop.eup %2767 }
 0xa46   : > { %v1979_v43 = vmul.f32 %v2768_v16, %v1947_v59 }
 0xa48   : > { %v1987_v17 = vmul.f32 %v1984_v57, %v1979_v43 }
 0xa49   : > { %v2770_v35 = vpop.eup %2769 }
 0xa4a   : > { %v1995_v18 = vadd.f32 %v1992_v1, %v1987_v17  ;;  %v1980_v44 = vmul.f32 %v2770_v35, %v1948_v38 }
 0xa4c   : > { %2618 = vmatprep.mubr.msk.f32.mxu0 %vm267_vm0, %v1995_v18  ;;  %v1988_v19 = vmul.f32 %v1984_v57, %v1980_v44 }
 0xa4e   : > { %v1996_v20 = vadd.f32 %v1992_v1, %v1988_v19 }
 0xa50   : > { %2619 = vmatmul.mubr.msk.f32.gmra.mxu0 %vm267_vm0, %v1996_v20 }
 0xad4   : > { %v2617_v58 = vpop.f32.mrf.mxu0 }
 0xad5   : > { %v2090_v24 = vadd.f32 %v2617_v58, %v2005_v23 }
 0xad6   : > { %v2084_v25 = vpop.f32.mrf.mxu0 }
 0xad7   : > { %v2085_v26 = vadd.f32 %v2084_v25, %v2005_v23  ;;  %v2104_v28 = vmax.f32 %v2090_v24, 0.0 }
 0xad9   : > { %v2103_v27 = vmax.f32 %v2085_v26, 0.0 }
 0xadb   : > { %2629 = vmatprep.mubr.msk.f32.mxu1 %vm267_vm0, %v2103_v27 }
 0xadc   : > { %2630 = vmatmul.mubr.msk.f32.vlgmr.msra.gmra.mxu1 %vm267_vm0, %v2104_v28 }
 0xb10   : > { %v2620_v15 = vpop.f32.mrf.mxu0 }
 0xb11   : > { %v2100_v52 = vadd.f32 %v2620_v15, %v2005_v23 }
 0xb12   : > { %v2094_v2 = vpop.f32.mrf.mxu0 }
 0xb13   : > { %v2095_v54 = vadd.f32 %v2094_v2, %v2005_v23  ;;  %v2106_v29 = vmax.f32 %v2100_v52, 0.0 }
 0xb15   : > { %v2105_v4 = vmax.f32 %v2095_v54, 0.0 }
 0xb17   : > { %2632 = vmatprep.mubr.msk.f32.mxu1 %vm267_vm0, %v2105_v4 }
 0xb18   : > { %2633 = vmatmul.mubr.msk.f32.gmra.mxu1 %vm267_vm0, %v2106_v29 }
 0xb9c   : > { %v2631_v49 = vpop.f32.mrf.mxu1 }
 0xb9d   : > { %v2200_v59 = vadd.f32 %v2631_v49, %v2115_v31 }
 0xb9e   : > { %v2194_v30 = vpop.f32.mrf.mxu1 }
 0xb9f   : > { %v2195_v32 = vadd.f32 %v2194_v30, %v2115_v31  ;;  %v2214_v36 = vadd.f32 %v2200_v59, %v1994_v10 }
 0xba1   : > { %v2213_v34 = vadd.f32 %v2195_v32, %v1993_v8  ;;  %v2224_v38 = vsel %vm267_vm0, %v2214_v36, 0.0 }
 0xba2   : > { %v2225_v42 = vrot.slane %v2224_v38, 4 }
 0xba3   : > { %v2217_v37 = vsel %vm267_vm0, %v2213_v34, 0.0 }
 0xba4   : > { %v2218_v40 = vrot.slane %v2217_v37, 4  ;;  %v2226_v46 = vadd.f32 %v2225_v42, %v2224_v38 }
 0xba6   : > { %v2219_v45 = vadd.f32 %v2218_v40, %v2217_v37  ;;  %v2227_v53 = vrot.slane %v2226_v46, 2 }
 0xba8   : > { %v2220_v47 = vrot.slane %v2219_v45, 2  ;;  %v2228_v61 = vadd.f32 %v2227_v53, %v2226_v46 }
 0xbaa   : > { %v2221_v50 = vadd.f32 %v2220_v47, %v2219_v45  ;;  %v2229_v10 = vrot.slane %v2228_v61, 1 }
 0xbac   : > { %v2222_v3 = vrot.slane %v2221_v50, 1  ;;  %v2230_v11 = vadd.f32 %v2229_v10, %v2228_v61 }
 0xbae   : > { %v2223_v9 = vadd.f32 %v2222_v3, %v2221_v50 }
 0xbb0   : > { %v2245_v43 = vmul.f32 0.125, %v2223_v9 }
 0xbd8   : > { %v2634_v5 = vpop.f32.mrf.mxu1 }
 0xbd9   : > { %v2210_v48 = vadd.f32 %v2634_v5, %v2115_v31 }
 0xbda   : > { %v2204_v51 = vpop.f32.mrf.mxu1 }
 0xbdb   : > { %v2216_v55 = vadd.f32 %v2210_v48, %v1996_v20  ;;  %v2205_v33 = vadd.f32 %v2204_v51, %v2115_v31 }
 0xbdd   : > { %v2238_v56 = vsel %vm267_vm0, %v2216_v55, 0.0  ;;  %v2215_v57 = vadd.f32 %v2205_v33, %v1995_v18  ;;  %v2246_v18 = vmul.f32 0.125, %v2230_v11 }
 0xbde   : > { %v2239_v60 = vrot.slane %v2238_v56, 4 }
 0xbdf   : > { %v2231_v62 = vsel %vm267_vm0, %v2215_v57, 0.0  ;;  %v2254_v20 = vsel %vm2253_vm4, %v2246_v18, %v2245_v43 }
 0xbe0   : > { %v2240_v63 = vadd.f32 %v2239_v60, %v2238_v56  ;;  %v2232_v1 = vrot.slane %v2231_v62, 4 }
 0xbe2   : > { %v2241_v7 = vrot.slane %v2240_v63, 2  ;;  %v2233_v8 = vadd.f32 %v2232_v1, %v2231_v62 }
 0xbe4   : > { %v2242_v39 = vadd.f32 %v2241_v7, %v2240_v63  ;;  %v2234_v41 = vrot.slane %v2233_v8, 2 }
 0xbe6   : > { %v2243_v13 = vrot.slane %v2242_v39, 1  ;;  %v2235_v12 = vadd.f32 %v2234_v41, %v2233_v8 }
 0xbe8   : > { %v2236_v16 = vrot.slane %v2235_v12, 1  ;;  %v2244_v17 = vadd.f32 %v2243_v13, %v2242_v39 }
 0xbea   : > { %v2237_v35 = vadd.f32 %v2236_v16, %v2235_v12  ;;  %v2248_v19 = vmul.f32 0.125, %v2244_v17 }
 0xbec   : > { %v2247_v44 = vmul.f32 0.125, %v2237_v35 }
 0xbee   : > { %v2256_v21 = vsel %vm2255_vm5, %v2247_v44, %v2254_v20 }
 0xbef   : > { %v2258_v6 = vsel %vm2257_vm6, %v2248_v19, %v2256_v21 }
 0xbf0   : > { %2261 = vst.msk [vmem:[%s259_s29] sm:$0xf] %vm2260_vm7, %v2258_v6 }
 0xbf1   : > { %2890 = shalt.err (!%p2887_p10)
}
 0xbf2   : > { %s2891_s6 = scalar_lea.hbm %s3427_s26, 64  ;;  %s2895_s10 = scalar_lea.hbm %s3468_s4, 128 }
 0xbf3   : > { %p2892_p6 = scmp.ne.s32.totalorder %s3427_s26, %s2891_s6  ;;  %p2896_p3 = scmp.lt.s32.totalorder %s3427_s26, %s3468_s4 }
 0xbf4   : > { %p2897_p11 = scmp.lt.s32.totalorder %s2895_s10, %s2891_s6 }
 0xbf5   : > { %p2893_p4 = pnand %p2892_p6, %p3485_p1 }
 0xbf6   : > { %p2898_p5 = por %p2897_p11, %p2896_p3 }
 0xbf7   : > { %p2894_p8 = pneg %p2893_p4 }
 0xbf9   : > { %p2899_p7 = pnand %p2898_p5, %p2894_p8 }
 0xbfb   : > { %2902 = shalt.err (!%p2899_p7)
}
 0xbfc   : > { %2649 = dma.vmem_to_hbm [thread:$0]  (%p3485_p1), %s2277_s9, 64, %s3427_s26, %s2263_s5  }
 0xbfd PF: > { %s2288_s14 = sand.u32 1, %s2937_s15   ;;  %p3486_p12 = scmp.ne.s32.totalorder %s3474_s22, 0 }
 0xbfe   : > { %p3487_p9 = scmp.ge.s32.totalorder %s2949_s18, 2  ;;  %s2289_s8 = scalar_lea.sflag [#allocation4], %s2288_s14 }
 0xc00   : > { %p2666_p13 = pnand %p3487_p9, %p3486_p12 }
 0xc02   : > { %p2667_p0 = pneg %p2666_p13 }
 0xc04   : > { %2932 = dma.done.wait (%p2667_p0), %s2289_s8, 64  }
 0xc05   : > { %2934 = vsyncadd (%p2667_p0), %s2289_s8, 4294967232  ;;  %p19_p2 = scmp.ge.s32.totalorder %s3081_s24, 4   ;;  %s3488_s15 = smov %s2941_s16 }
 0xc06   : > { %s3489_s16 = smov %s2945_s17  ;;  %s3490_s17 = smov %s3091_s27 }
 0xc07   : > { %s3491_s18 = smov %s3081_s24  ;;  %21 = sbr.rel (!%p19_p2) target bundleno = 7 (0x7), region = 95 }
 0xc0c   :  { %2294 = vsyncpa [#allocation3], 1 }
 0xc0d   :  { %2296 = vsyncpa [#allocation3 + $0x1], 1 }
 0xc0e   :  { %2297 = vsyncpa [#allocation6], 1 }
 0xc0f   :  { %2298 = vsyncpa [#allocation9], 1 }
 0xc10   :  { %2299 = vsyncpa [#allocation4], 1 }
 0xc11   :  { %2301 = vsyncpa [#allocation4 + $0x1], 1 }

</bundles_post_ra>
